<compile_context>
chip_gen: v6e
topology: v6e:2x2x1
jax: 0.10.0
libtpu: 0.0.40
codegen_flags: <defaults>
</compile_context>

<pallas_src>
import functools
import math

import jax
import jax.numpy as jnp
from jax.experimental import pallas as pl
from jax.experimental.pallas import tpu as pltpu

_LN_EPS = 1e-5             # nn.LayerNorm default
_NEG_SLOPE = 0.01          # nn.LeakyReLU default
_MXU_DTYPE = jnp.bfloat16  # MXU input dtype; accumulation stays float32.


def _dot(a, b):
    """MXU matmul: bf16 inputs, f32 accumulate."""
    return jnp.dot(a.astype(_MXU_DTYPE), b.astype(_MXU_DTYPE),
                   preferred_element_type=jnp.float32)


def _dot_nt(a, b):
    """a @ b.T on the MXU (contract last dims), bf16 in / f32 out."""
    return jax.lax.dot_general(
        a.astype(_MXU_DTYPE), b.astype(_MXU_DTYPE),
        (((1,), (1,)), ((), ())), preferred_element_type=jnp.float32)


def _leaky_relu(x):
    return jnp.where(x >= 0, x, _NEG_SLOPE * x)


def _layer_norm(y, gamma, beta):
    mu = jnp.mean(y, axis=-1, keepdims=True)
    var = jnp.mean((y - mu) ** 2, axis=-1, keepdims=True)
    return (y - mu) * jax.lax.rsqrt(var + _LN_EPS) * gamma + beta


def _full_spec(a):
    nd = a.ndim
    return pl.BlockSpec(a.shape, lambda i, _nd=nd: (0,) * _nd)


# --------------------- fused QKV projection (one matmul) ---------------------

def _qkv_kernel(x_ref, w_ref, b_ref, o_ref):
    o_ref[0] = _dot(x_ref[0], w_ref[...]) + b_ref[...]


def qkv_projection(x, w, b):
    B, L, D = x.shape
    N = w.shape[1]
    return pl.pallas_call(
        _qkv_kernel,
        out_shape=jax.ShapeDtypeStruct((B, L, N), jnp.float32),
        grid=(B,),
        in_specs=[
            pl.BlockSpec((1, L, D), lambda b: (b, 0, 0)),
            pl.BlockSpec((D, N), lambda b: (0, 0)),
            pl.BlockSpec((1, N), lambda b: (0, 0)),
        ],
        out_specs=pl.BlockSpec((1, L, N), lambda b: (b, 0, 0)),
        compiler_params=pltpu.CompilerParams(dimension_semantics=("parallel",)),
    )(x, w, b.reshape(1, N))


# ------- attention core + Wo linear + residual + LayerNorm + seq-mean --------

def _attn_block_kernel(q_ref, k_ref, v_ref, pad_ref, x_ref, wo_ref, bo_ref,
                       g_ref, be_ref, mean_ref, *, d_k, d_v, n_heads):
    x_b = x_ref[0]                       # (L, D) residual
    key_pad = pad_ref[0]                 # (1, L), broadcasts over query rows
    scale = 1.0 / math.sqrt(d_k)
    acc = None
    for h in range(n_heads):             # static head loop (tiny H)
        qh = q_ref[0, h]                 # (L, d_k)
        kh = k_ref[0, h]
        vh = v_ref[0, h]                 # (L, d_v)
        s = _dot_nt(qh, kh) * scale      # (L, L)
        s = jnp.where(key_pad > 0.5, jnp.float32(-1e9), s)
        m = jnp.max(s, axis=-1, keepdims=True)
        e = jnp.exp(s - m)
        p = e * pl.reciprocal(jnp.sum(e, axis=-1, keepdims=True), approx=True)
        ctx_h = _dot(p, vh)                                        # (L, d_v)
        # context-concat + Wo fused as a sum over per-head Wo slices.
        contrib = _dot(ctx_h, wo_ref[h * d_v:(h + 1) * d_v, :])    # (L, D)
        acc = contrib if acc is None else acc + contrib
    y = _layer_norm(acc + bo_ref[...] + x_b, g_ref[...], be_ref[...])
    mean_ref[0] = jnp.mean(y, axis=0, keepdims=True)               # seq-mean


def attention_block(q, k, v, pad, x, wo, bo, gamma, beta, d_k):
    B, H, L, dk = q.shape
    dv = v.shape[-1]
    D = x.shape[-1]
    kern = functools.partial(_attn_block_kernel, d_k=d_k, d_v=dv, n_heads=H)
    mean = pl.pallas_call(
        kern,
        out_shape=jax.ShapeDtypeStruct((B, 1, D), jnp.float32),
        grid=(B,),
        in_specs=[
            pl.BlockSpec((1, H, L, dk), lambda b: (b, 0, 0, 0)),
            pl.BlockSpec((1, H, L, dk), lambda b: (b, 0, 0, 0)),
            pl.BlockSpec((1, H, L, dv), lambda b: (b, 0, 0, 0)),
            pl.BlockSpec((1, 1, L), lambda b: (b, 0, 0)),
            pl.BlockSpec((1, L, D), lambda b: (b, 0, 0)),
            pl.BlockSpec((H * dv, D), lambda b: (0, 0)),
            pl.BlockSpec((1, D), lambda b: (0, 0)),
            pl.BlockSpec((1, D), lambda b: (0, 0)),
            pl.BlockSpec((1, D), lambda b: (0, 0)),
        ],
        out_specs=pl.BlockSpec((1, 1, D), lambda b: (b, 0, 0)),
        compiler_params=pltpu.CompilerParams(dimension_semantics=("parallel",)),
    )(q, k, v, pad, x, wo, bo.reshape(1, D), gamma.reshape(1, D),
      beta.reshape(1, D))
    return mean[:, 0, :]


# ---------- Conv1D block: padded buffer, in-kernel taps, residual, mean ------

def _conv_block_kernel(xp_ref, w3_ref, b1_ref, wp_ref, b2_ref, mean_ref, *, L, D):
    xm1 = xp_ref[0, 0:L, :]
    x0 = xp_ref[0, 1:L + 1, :]
    xp1 = xp_ref[0, 2:L + 2, :]
    h = (_dot(xm1, w3_ref[0:D, :])
         + _dot(x0, w3_ref[D:2 * D, :])
         + _dot(xp1, w3_ref[2 * D:3 * D, :])
         + b1_ref[...])
    h = _leaky_relu(h)
    y = _dot(h, wp_ref[...]) + b2_ref[...] + x0     # conv + residual (no LN)
    mean_ref[0] = jnp.mean(y, axis=0, keepdims=True)


def conv_block(x_pad, w3, b1, wp, b2):
    B, Lp2, D = x_pad.shape
    L = Lp2 - 2
    dff = w3.shape[1]
    kern = functools.partial(_conv_block_kernel, L=L, D=D)
    mean = pl.pallas_call(
        kern,
        out_shape=jax.ShapeDtypeStruct((B, 1, D), jnp.float32),
        grid=(B,),
        in_specs=[
            pl.BlockSpec((1, Lp2, D), lambda b: (b, 0, 0)),
            pl.BlockSpec((3 * D, dff), lambda b: (0, 0)),
            pl.BlockSpec((1, dff), lambda b: (0, 0)),
            pl.BlockSpec((dff, D), lambda b: (0, 0)),
            pl.BlockSpec((1, D), lambda b: (0, 0)),
        ],
        out_specs=pl.BlockSpec((1, 1, D), lambda b: (b, 0, 0)),
        compiler_params=pltpu.CompilerParams(dimension_semantics=("parallel",)),
    )(x_pad, w3, b1.reshape(1, dff), wp, b2.reshape(1, D))
    return mean[:, 0, :]


# ----- BiLSTM: hoisted input projection, fwd+bwd in one body, fused head -----

def _bilstm_recurrence(x, wf_ref, uf_ref, bf_ref, wb_ref, ub_ref, bb_ref,
                       gf_ref, gb_ref, hf_ref, hb_ref, *, L, B, Hd):
    # Hoisted input projection: one (L*B, In)x(In, 4Hd) matmul per direction.
    gf_ref[...] = _dot(x, wf_ref[...]) + bf_ref[...]
    gb_ref[...] = _dot(x, wb_ref[...]) + bb_ref[...]

    def make_body(g_ref, u_ref, h_ref, reverse):
        def body(s, carry):
            h, c = carry
            t = (L - 1 - s) if reverse else s
            g = g_ref[pl.ds(t * B, B), :] + _dot(h, u_ref[...])
            i = jax.nn.sigmoid(g[:, 0:Hd])
            f = jax.nn.sigmoid(g[:, Hd:2 * Hd])
            gg = jnp.tanh(g[:, 2 * Hd:3 * Hd])
            o = jax.nn.sigmoid(g[:, 3 * Hd:4 * Hd])
            c_new = f * c + i * gg
            h_new = o * jnp.tanh(c_new)
            h_ref[pl.ds(t * B, B), :] = h_new
            return (h_new, c_new)
        return body

    zero = jnp.zeros((B, Hd), jnp.float32)
    jax.lax.fori_loop(0, L, make_body(gf_ref, uf_ref, hf_ref, False), (zero, zero))
    jax.lax.fori_loop(0, L, make_body(gb_ref, ub_ref, hb_ref, True), (zero, zero))


def _bilstm_layer_kernel(x_ref, wf_ref, uf_ref, bf_ref, wb_ref, ub_ref, bb_ref,
                         out_ref, gf_ref, gb_ref, hf_ref, hb_ref, *, L, B, Hd):
    _bilstm_recurrence(x_ref[...], wf_ref, uf_ref, bf_ref, wb_ref, ub_ref, bb_ref,
                       gf_ref, gb_ref, hf_ref, hb_ref, L=L, B=B, Hd=Hd)
    out_ref[:, 0:Hd] = hf_ref[...]
    out_ref[:, Hd:2 * Hd] = hb_ref[...]


def _bilstm_head_kernel(x_ref, wf_ref, uf_ref, bf_ref, wb_ref, ub_ref, bb_ref,
                        res_ref, sel_ref, wl_ref, bl_ref, g_ref, be_ref,
                        mean_ref, gf_ref, gb_ref, hf_ref, hb_ref, *, L, B, Hd):
    _bilstm_recurrence(x_ref[...], wf_ref, uf_ref, bf_ref, wb_ref, ub_ref, bb_ref,
                       gf_ref, gb_ref, hf_ref, hb_ref, L=L, B=B, Hd=Hd)
    # [fwd|bwd] concat + Wl linear fused as two matmuls over Wl row slices.
    proj = (_dot(hf_ref[...], wl_ref[0:Hd, :])
            + _dot(hb_ref[...], wl_ref[Hd:2 * Hd, :])
            + bl_ref[...])
    y = _layer_norm(proj + res_ref[...], g_ref[...], be_ref[...])
    # sel (B, L*B) holds 1/L on each batch's time-major rows -> per-batch mean.
    mean_ref[...] = jnp.dot(sel_ref[...], y, preferred_element_type=jnp.float32)


def _lstm_inputs(x_flat, pf, pb):
    return (x_flat,
            pf['Wih'].T, pf['Whh'].T, (pf['bih'] + pf['bhh']).reshape(1, -1),
            pb['Wih'].T, pb['Whh'].T, (pb['bih'] + pb['bhh']).reshape(1, -1))


def bilstm_layer(x_flat, pf, pb, B, Hd):
    LB = x_flat.shape[0]
    L = LB // B
    inputs = _lstm_inputs(x_flat, pf, pb)
    kern = functools.partial(_bilstm_layer_kernel, L=L, B=B, Hd=Hd)
    return pl.pallas_call(
        kern,
        out_shape=jax.ShapeDtypeStruct((LB, 2 * Hd), jnp.float32),
        grid=(1,),
        in_specs=[_full_spec(a) for a in inputs],
        out_specs=pl.BlockSpec((LB, 2 * Hd), lambda i: (0, 0)),
        scratch_shapes=[pltpu.VMEM((LB, 4 * Hd), jnp.float32),
                        pltpu.VMEM((LB, 4 * Hd), jnp.float32),
                        pltpu.VMEM((LB, Hd), jnp.float32),
                        pltpu.VMEM((LB, Hd), jnp.float32)],
    )(*inputs)


def bilstm_head(x_flat, pf, pb, resid_flat, sel, wl, bl, gamma, beta, Hd):
    LB = x_flat.shape[0]
    B = sel.shape[0]
    L = LB // B
    D = wl.shape[1]
    inputs = _lstm_inputs(x_flat, pf, pb) + (
        resid_flat, sel, wl, bl.reshape(1, D),
        gamma.reshape(1, D), beta.reshape(1, D))
    kern = functools.partial(_bilstm_head_kernel, L=L, B=B, Hd=Hd)
    return pl.pallas_call(
        kern,
        out_shape=jax.ShapeDtypeStruct((B, D), jnp.float32),
        grid=(1,),
        in_specs=[_full_spec(a) for a in inputs],
        out_specs=pl.BlockSpec((B, D), lambda i: (0, 0)),
        scratch_shapes=[pltpu.VMEM((LB, 4 * Hd), jnp.float32),
                        pltpu.VMEM((LB, 4 * Hd), jnp.float32),
                        pltpu.VMEM((LB, Hd), jnp.float32),
                        pltpu.VMEM((LB, Hd), jnp.float32)],
    )(*inputs)


# ----------------------------- compressor MLP --------------------------------

def _compressor_kernel(ma_ref, mc_ref, ml_ref, w1_ref, b1_ref, g_ref, be_ref,
                       w2_ref, b2_ref, o_ref, *, D):
    x = (_dot(ma_ref[...], w1_ref[0:D, :])
         + _dot(mc_ref[...], w1_ref[D:2 * D, :])
         + _dot(ml_ref[...], w1_ref[2 * D:3 * D, :])
         + b1_ref[...])
    h = _leaky_relu(_layer_norm(x, g_ref[...], be_ref[...]))
    o_ref[...] = _dot(h, w2_ref[...]) + b2_ref[...]


def compressor(attn_mean, conv_mean, lstm_mean, w1, b1, g1, be1, w2, b2):
    B, D = attn_mean.shape
    s1 = w1.shape[1]
    s2 = w2.shape[1]
    kern = functools.partial(_compressor_kernel, D=D)
    return pl.pallas_call(
        kern,
        out_shape=jax.ShapeDtypeStruct((B, s2), jnp.float32),
    )(attn_mean, conv_mean, lstm_mean, w1, b1.reshape(1, s1),
      g1.reshape(1, s1), be1.reshape(1, s1), w2, b2.reshape(1, s2))


# ------------------------------- glue / model --------------------------------

def sinusoidal_pe(L, D):
    position = jnp.arange(L, dtype=jnp.float32)[:, None]
    div_term = jnp.exp(
        jnp.arange(0, D, 2, dtype=jnp.float32) * (-math.log(10000.0) / D))
    pe = jnp.zeros((L, D), jnp.float32)
    pe = pe.at[:, 0::2].set(jnp.sin(position * div_term))
    pe = pe.at[:, 1::2].set(jnp.cos(position * div_term))
    return pe


def init_params(key, vocab, D, d_k, d_v, H, d_ff, d_hidden, n_layers, s1, s2):
    keys = iter(jax.random.split(key, 64))

    def p(shape, scale=0.1):
        return (scale * jax.random.normal(next(keys), shape)).astype(jnp.float32)

    params = {
        'emb': p((vocab, D), 1.0),
        # MultiHeadAttention (weights stored [in, out])
        'Wq': p((D, H * d_k)), 'bq': p((H * d_k,)),
        'Wk': p((D, H * d_k)), 'bk': p((H * d_k,)),
        'Wv': p((D, H * d_v)), 'bv': p((H * d_v,)),
        'Wo': p((H * d_v, D)), 'bo': p((D,)),
        'ln_attn_g': jnp.ones((D,), jnp.float32),
        'ln_attn_b': jnp.zeros((D,), jnp.float32),
        # Convolution1D
        'Wc1': p((d_ff, D, 3)), 'bc1': p((d_ff,)),
        'Wc2': p((D, d_ff, 1)), 'bc2': p((D,)),
        # BiLSTM projection + LN
        'Wl': p((2 * d_hidden, D)), 'bl': p((D,)),
        'ln_lstm_g': jnp.ones((D,), jnp.float32),
        'ln_lstm_b': jnp.zeros((D,), jnp.float32),
        # Compressor
        'Wcp1': p((3 * D, s1)), 'bcp1': p((s1,)),
        'ln_cp_g': jnp.ones((s1,), jnp.float32),
        'ln_cp_b': jnp.zeros((s1,), jnp.float32),
        'Wcp2': p((s1, s2)), 'bcp2': p((s2,)),
    }
    lstm = []
    for layer in range(n_layers):
        in_size = D if layer == 0 else 2 * d_hidden
        dirs = []
        for _ in range(2):  # forward, backward
            dirs.append(dict(
                Wih=p((4 * d_hidden, in_size)),
                Whh=p((4 * d_hidden, d_hidden)),
                bih=p((4 * d_hidden,)),
                bhh=p((4 * d_hidden,)),
            ))
        lstm.append(dirs)
    params['lstm'] = lstm
    return params


def siamprom_forward(tokens, params, *, D, d_k, d_v, H, d_hidden, n_layers):
    B, L = tokens.shape

    # --- SeqEmbedding: token lookup + sinusoidal positional encoding (glue) ---
    emb = jnp.take(params['emb'], tokens, axis=0)              # [B, L, D]
    x = emb + sinusoidal_pe(L, D)[None, :, :]
    # TODO(synk): nn.Dropout(p=0.1) is stochastic; implemented as eval-mode identity.

    # --- MultiHeadAttention: fused QKV matmul, then per-batch fused core ------
    Wqkv = jnp.concatenate([params['Wq'], params['Wk'], params['Wv']], axis=1)
    bqkv = jnp.concatenate([params['bq'], params['bk'], params['bv']], axis=0)
    qkv = qkv_projection(x, Wqkv, bqkv)                        # [B, L, H*(2dk+dv)]
    hdk = H * d_k
    # replicates the original .view(B, H, -1, d_k) semantics (no transpose).
    q = qkv[:, :, :hdk].reshape(B, H, L, d_k)
    k = qkv[:, :, hdk:2 * hdk].reshape(B, H, L, d_k)
    v = qkv[:, :, 2 * hdk:].reshape(B, H, L, d_v)
    pad = (tokens == 0).astype(jnp.float32).reshape(B, 1, L)   # key-padding vector
    attn_mean = attention_block(q, k, v, pad, x, params['Wo'], params['bo'],
                                params['ln_attn_g'], params['ln_attn_b'], d_k)

    # --- Convolution1D: one padded buffer, taps sliced in-kernel --------------
    x_pad = jnp.pad(x, ((0, 0), (1, 1), (0, 0)))               # [B, L+2, D]
    W3 = jnp.concatenate([params['Wc1'][:, :, t].T for t in range(3)], axis=0)
    Wp = params['Wc2'][:, :, 0].T
    conv_mean = conv_block(x_pad, W3, params['bc1'], Wp, params['bc2'])

    # --- BiLSTM: time-major flat layout (row = t*B + b) -----------------------
    x_tm = x.transpose(1, 0, 2).reshape(L * B, D)
    h_flat = x_tm
    for layer in range(n_layers - 1):
        pf, pb = params['lstm'][layer]
        h_flat = bilstm_layer(h_flat, pf, pb, B, d_hidden)
    pf, pb = params['lstm'][n_layers - 1]
    sel = (jnp.arange(L * B)[None, :] % B
           == jnp.arange(B)[:, None]).astype(jnp.float32) / L  # per-batch mean selector
    lstm_mean = bilstm_head(h_flat, pf, pb, x_tm, sel,
                            params['Wl'], params['bl'],
                            params['ln_lstm_g'], params['ln_lstm_b'], d_hidden)

    # --- Compressor: concat of seq-means -> Linear -> LN -> LeakyReLU -> Linear
    return compressor(attn_mean, conv_mean, lstm_mean,
                      params['Wcp1'], params['bcp1'],
                      params['ln_cp_g'], params['ln_cp_b'],
                      params['Wcp2'], params['bcp2'])


if __name__ == "__main__":
    VOCAB, D, DK, DV, H = 16, 32, 8, 8, 4
    DFF, DH, NL, S1, S2 = 64, 16, 1, 32, 16
    B, L = 2, 8

    key = jax.random.PRNGKey(0)
    k_param, k_tok = jax.random.split(key)
    params = init_params(k_param, VOCAB, D, DK, DV, H, DFF, DH, NL, S1, S2)
    tokens = jax.random.randint(k_tok, (B, L), 0, VOCAB, dtype=jnp.int32)

    fwd = jax.jit(functools.partial(siamprom_forward, D=D, d_k=DK, d_v=DV, H=H,
                                    d_hidden=DH, n_layers=NL))
    out = jax.block_until_ready(fwd(tokens, params))
    assert out.shape == (B, S2) and out.dtype == jnp.float32
    assert bool(jnp.all(jnp.isfinite(out)))
    print("KERNEL_OK")
</pallas_src>

<mosaic_0001>
module attributes {stable_mosaic.version = 11 : i64} {
  func.func @_qkv_kernel(%arg0: i32, %arg1: memref<1x8x32xf32, #tpu.memory_space<vmem>>, %arg2: memref<32x96xf32, #tpu.memory_space<vmem>>, %arg3: memref<1x96xf32, #tpu.memory_space<vmem>>, %arg4: memref<1x8x96xf32, #tpu.memory_space<vmem>>) attributes {dimension_semantics = [#tpu.dimension_semantics<parallel>], iteration_bounds = array<i64: 2>, scalar_prefetch = 0 : i64, scratch_operands = 0 : i64, tpu.core_type = #tpu.core_type<tc>, window_params = [{transform_indices = @transform_0, window_bounds = array<i64: 1, 8, 32>}, {pipeline_mode = #tpu.pipeline_mode<synchronous>, transform_indices = @transform_1, window_bounds = array<i64: 32, 96>}, {pipeline_mode = #tpu.pipeline_mode<synchronous>, transform_indices = @transform_2, window_bounds = array<i64: 1, 96>}, {transform_indices = @transform_3, window_bounds = array<i64: 1, 8, 96>}]} {
    %c0 = arith.constant 0 : index
    %c0_0 = arith.constant 0 : index
    %c0_1 = arith.constant 0 : index
    %0 = vector.load %arg1[%c0, %c0_0, %c0_1] : memref<1x8x32xf32, #tpu.memory_space<vmem>>, vector<1x8x32xf32>
    %1 = vector.shape_cast %0 : vector<1x8x32xf32> to vector<8x32xf32>
    %c0_2 = arith.constant 0 : index
    %c0_3 = arith.constant 0 : index
    %2 = vector.load %arg2[%c0_2, %c0_3] : memref<32x96xf32, #tpu.memory_space<vmem>>, vector<32x96xf32>
    %3 = arith.truncf %1 : vector<8x32xf32> to vector<8x32xbf16>
    %4 = arith.truncf %2 : vector<32x96xf32> to vector<32x96xbf16>
    %cst = arith.constant dense<0.000000e+00> : vector<8x96xf32>
    %5 = tpu.matmul %3, %4, %cst {dimension_numbers = #tpu.dot_dimension_numbers<[1], [0], [0], [1], [0, 0, 1, 1], [], []>} : vector<8x32xbf16>, vector<32x96xbf16>, vector<8x96xf32> -> vector<8x96xf32>
    %c0_4 = arith.constant 0 : index
    %c0_5 = arith.constant 0 : index
    %6 = vector.load %arg3[%c0_4, %c0_5] : memref<1x96xf32, #tpu.memory_space<vmem>>, vector<1x96xf32>
    %7 = vector.broadcast %6 : vector<1x96xf32> to vector<8x96xf32>
    %8 = arith.addf %5, %7 : vector<8x96xf32>
    %c0_6 = arith.constant 0 : index
    %c0_7 = arith.constant 0 : index
    %c0_8 = arith.constant 0 : index
    %9 = vector.load %arg4[%c0_6, %c0_7, %c0_8] : memref<1x8x96xf32, #tpu.memory_space<vmem>>, vector<1x8x96xf32>
    %10 = vector.shape_cast %9 : vector<1x8x96xf32> to vector<8x96xf32>
    %11 = vector.shape_cast %8 : vector<8x96xf32> to vector<1x8x96xf32>
    tpu.vector_store %arg4[%c0_6, %c0_7, %c0_8], %11 {strides = array<i32>} : memref<1x8x96xf32, #tpu.memory_space<vmem>>, vector<1x8x96xf32>,
    return
  }
  func.func @transform_0(%arg0: i32) -> (i32, i32, i32) {
    %c0_i32 = arith.constant 0 : i32
    %c0_i32_0 = arith.constant 0 : i32
    %c0_i32_1 = arith.constant 0 : i32
    return %arg0, %c0_i32, %c0_i32_0 : i32, i32, i32
  }
  func.func @transform_1(%arg0: i32) -> (i32, i32) {
    %c0_i32 = arith.constant 0 : i32
    %c0_i32_0 = arith.constant 0 : i32
    %c0_i32_1 = arith.constant 0 : i32
    return %c0_i32, %c0_i32_0 : i32, i32
  }
  func.func @transform_2(%arg0: i32) -> (i32, i32) {
    %c0_i32 = arith.constant 0 : i32
    %c0_i32_0 = arith.constant 0 : i32
    %c0_i32_1 = arith.constant 0 : i32
    return %c0_i32, %c0_i32_0 : i32, i32
  }
  func.func @transform_3(%arg0: i32) -> (i32, i32, i32) {
    %c0_i32 = arith.constant 0 : i32
    %c0_i32_0 = arith.constant 0 : i32
    %c0_i32_1 = arith.constant 0 : i32
    return %arg0, %c0_i32, %c0_i32_0 : i32, i32, i32
  }
}

module attributes {stable_mosaic.version = 11 : i64} {
  func.func @_attn_block_kernel(%arg0: i32, %arg1: memref<1x4x8x8xf32, #tpu.memory_space<vmem>>, %arg2: memref<1x4x8x8xf32, #tpu.memory_space<vmem>>, %arg3: memref<1x4x8x8xf32, #tpu.memory_space<vmem>>, %arg4: memref<1x1x8xf32, #tpu.memory_space<vmem>>, %arg5: memref<1x8x32xf32, #tpu.memory_space<vmem>>, %arg6: memref<32x32xf32, #tpu.memory_space<vmem>>, %arg7: memref<1x32xf32, #tpu.memory_space<vmem>>, %arg8: memref<1x32xf32, #tpu.memory_space<vmem>>, %arg9: memref<1x32xf32, #tpu.memory_space<vmem>>, %arg10: memref<1x1x32xf32, #tpu.memory_space<vmem>>) attributes {dimension_semantics = [#tpu.dimension_semantics<parallel>], iteration_bounds = array<i64: 2>, scalar_prefetch = 0 : i64, scratch_operands = 0 : i64, tpu.core_type = #tpu.core_type<tc>, window_params = [{transform_indices = @transform_0, window_bounds = array<i64: 1, 4, 8, 8>}, {transform_indices = @transform_1, window_bounds = array<i64: 1, 4, 8, 8>}, {transform_indices = @transform_2, window_bounds = array<i64: 1, 4, 8, 8>}, {transform_indices = @transform_3, window_bounds = array<i64: 1, 1, 8>}, {transform_indices = @transform_4, window_bounds = array<i64: 1, 8, 32>}, {pipeline_mode = #tpu.pipeline_mode<synchronous>, transform_indices = @transform_5, window_bounds = array<i64: 32, 32>}, {pipeline_mode = #tpu.pipeline_mode<synchronous>, transform_indices = @transform_6, window_bounds = array<i64: 1, 32>}, {pipeline_mode = #tpu.pipeline_mode<synchronous>, transform_indices = @transform_7, window_bounds = array<i64: 1, 32>}, {pipeline_mode = #tpu.pipeline_mode<synchronous>, transform_indices = @transform_8, window_bounds = array<i64: 1, 32>}, {transform_indices = @transform_9, window_bounds = array<i64: 1, 1, 32>}]} {
    %c0 = arith.constant 0 : index
    %c0_0 = arith.constant 0 : index
    %c0_1 = arith.constant 0 : index
    %0 = vector.load %arg5[%c0, %c0_0, %c0_1] : memref<1x8x32xf32, #tpu.memory_space<vmem>>, vector<1x8x32xf32>
    %1 = vector.shape_cast %0 : vector<1x8x32xf32> to vector<8x32xf32>
    %c0_2 = arith.constant 0 : index
    %c0_3 = arith.constant 0 : index
    %c0_4 = arith.constant 0 : index
    %2 = vector.load %arg4[%c0_2, %c0_3, %c0_4] : memref<1x1x8xf32, #tpu.memory_space<vmem>>, vector<1x1x8xf32>
    %3 = vector.shape_cast %2 : vector<1x1x8xf32> to vector<1x8xf32>
    %c0_5 = arith.constant 0 : index
    %c0_6 = arith.constant 0 : index
    %c0_7 = arith.constant 0 : index
    %c0_8 = arith.constant 0 : index
    %4 = vector.load %arg1[%c0_5, %c0_6, %c0_7, %c0_8] : memref<1x4x8x8xf32, #tpu.memory_space<vmem>>, vector<1x1x8x8xf32>
    %5 = vector.shape_cast %4 : vector<1x1x8x8xf32> to vector<8x8xf32>
    %c0_9 = arith.constant 0 : index
    %c0_10 = arith.constant 0 : index
    %c0_11 = arith.constant 0 : index
    %c0_12 = arith.constant 0 : index
    %6 = vector.load %arg2[%c0_9, %c0_10, %c0_11, %c0_12] : memref<1x4x8x8xf32, #tpu.memory_space<vmem>>, vector<1x1x8x8xf32>
    %7 = vector.shape_cast %6 : vector<1x1x8x8xf32> to vector<8x8xf32>
    %c0_13 = arith.constant 0 : index
    %c0_14 = arith.constant 0 : index
    %c0_15 = arith.constant 0 : index
    %c0_16 = arith.constant 0 : index
    %8 = vector.load %arg3[%c0_13, %c0_14, %c0_15, %c0_16] : memref<1x4x8x8xf32, #tpu.memory_space<vmem>>, vector<1x1x8x8xf32>
    %9 = vector.shape_cast %8 : vector<1x1x8x8xf32> to vector<8x8xf32>
    %10 = arith.truncf %5 : vector<8x8xf32> to vector<8x8xbf16>
    %11 = arith.truncf %7 : vector<8x8xf32> to vector<8x8xbf16>
    %cst = arith.constant dense<0.000000e+00> : vector<8x8xf32>
    %12 = tpu.matmul %10, %11, %cst {dimension_numbers = #tpu.dot_dimension_numbers<[1], [1], [0], [0], [0, 0, 1, 0], [], []>} : vector<8x8xbf16>, vector<8x8xbf16>, vector<8x8xf32> -> vector<8x8xf32>
    %cst_17 = arith.constant 0.353553385 : f32
    %13 = vector.broadcast %cst_17 : f32 to vector<8x8xf32>
    %14 = arith.mulf %12, %13 : vector<8x8xf32>
    %cst_18 = arith.constant 5.000000e-01 : f32
    %15 = vector.broadcast %cst_18 : f32 to vector<1x8xf32>
    %16 = arith.cmpf ogt, %3, %15 : vector<1x8xf32>
    %cst_19 = arith.constant -1.000000e+09 : f32
    %17 = vector.shape_cast %16 : vector<1x8xi1> to vector<1x8xi1>
    %18 = vector.broadcast %17 : vector<1x8xi1> to vector<8x8xi1>
    %19 = vector.broadcast %cst_19 : f32 to vector<8x8xf32>
    %20 = arith.select %18, %19, %14 : vector<8x8xi1>, vector<8x8xf32>
    %cst_20 = arith.constant dense<0xFF800000> : vector<8xf32>
    %21 = vector.multi_reduction <maximumf>, %20, %cst_20 [1] : vector<8x8xf32> to vector<8xf32>
    %22 = vector.shape_cast %21 : vector<8xf32> to vector<8x1xf32>
    %23 = vector.broadcast %22 : vector<8x1xf32> to vector<8x8xf32>
    %24 = arith.subf %20, %23 : vector<8x8xf32>
    %25 = math.exp %24 : vector<8x8xf32>
    %cst_21 = arith.constant dense<0.000000e+00> : vector<8xf32>
    %26 = vector.multi_reduction <add>, %25, %cst_21 [1] : vector<8x8xf32> to vector<8xf32>
    %27 = vector.shape_cast %26 : vector<8xf32> to vector<8x1xf32>
    %28 = tpu.reciprocal %27 {approx = true} : vector<8x1xf32> -> vector<8x1xf32>
    %29 = vector.broadcast %28 : vector<8x1xf32> to vector<8x8xf32>
    %30 = arith.mulf %25, %29 : vector<8x8xf32>
    %31 = arith.truncf %30 : vector<8x8xf32> to vector<8x8xbf16>
    %32 = arith.truncf %9 : vector<8x8xf32> to vector<8x8xbf16>
    %cst_22 = arith.constant dense<0.000000e+00> : vector<8x8xf32>
    %33 = tpu.matmul %31, %32, %cst_22 {dimension_numbers = #tpu.dot_dimension_numbers<[1], [0], [0], [1], [0, 0, 1, 1], [], []>} : vector<8x8xbf16>, vector<8x8xbf16>, vector<8x8xf32> -> vector<8x8xf32>
    %c0_23 = arith.constant 0 : index
    %c0_24 = arith.constant 0 : index
    %34 = vector.load %arg6[%c0_23, %c0_24] : memref<32x32xf32, #tpu.memory_space<vmem>>, vector<8x32xf32>
    %35 = arith.truncf %33 : vector<8x8xf32> to vector<8x8xbf16>
    %36 = arith.truncf %34 : vector<8x32xf32> to vector<8x32xbf16>
    %cst_25 = arith.constant dense<0.000000e+00> : vector<8x32xf32>
    %37 = tpu.matmul %35, %36, %cst_25 {dimension_numbers = #tpu.dot_dimension_numbers<[1], [0], [0], [1], [0, 0, 1, 1], [], []>} : vector<8x8xbf16>, vector<8x32xbf16>, vector<8x32xf32> -> vector<8x32xf32>
    %c0_26 = arith.constant 0 : index
    %c1 = arith.constant 1 : index
    %c0_27 = arith.constant 0 : index
    %c0_28 = arith.constant 0 : index
    %38 = vector.load %arg1[%c0_26, %c1, %c0_27, %c0_28] : memref<1x4x8x8xf32, #tpu.memory_space<vmem>>, vector<1x1x8x8xf32>
    %39 = vector.shape_cast %38 : vector<1x1x8x8xf32> to vector<8x8xf32>
    %c0_29 = arith.constant 0 : index
    %c1_30 = arith.constant 1 : index
    %c0_31 = arith.constant 0 : index
    %c0_32 = arith.constant 0 : index
    %40 = vector.load %arg2[%c0_29, %c1_30, %c0_31, %c0_32] : memref<1x4x8x8xf32, #tpu.memory_space<vmem>>, vector<1x1x8x8xf32>
    %41 = vector.shape_cast %40 : vector<1x1x8x8xf32> to vector<8x8xf32>
    %c0_33 = arith.constant 0 : index
    %c1_34 = arith.constant 1 : index
    %c0_35 = arith.constant 0 : index
    %c0_36 = arith.constant 0 : index
    %42 = vector.load %arg3[%c0_33, %c1_34, %c0_35, %c0_36] : memref<1x4x8x8xf32, #tpu.memory_space<vmem>>, vector<1x1x8x8xf32>
    %43 = vector.shape_cast %42 : vector<1x1x8x8xf32> to vector<8x8xf32>
    %44 = arith.truncf %39 : vector<8x8xf32> to vector<8x8xbf16>
    %45 = arith.truncf %41 : vector<8x8xf32> to vector<8x8xbf16>
    %cst_37 = arith.constant dense<0.000000e+00> : vector<8x8xf32>
    %46 = tpu.matmul %44, %45, %cst_37 {dimension_numbers = #tpu.dot_dimension_numbers<[1], [1], [0], [0], [0, 0, 1, 0], [], []>} : vector<8x8xbf16>, vector<8x8xbf16>, vector<8x8xf32> -> vector<8x8xf32>
    %cst_38 = arith.constant 0.353553385 : f32
    %47 = vector.broadcast %cst_38 : f32 to vector<8x8xf32>
    %48 = arith.mulf %46, %47 : vector<8x8xf32>
    %cst_39 = arith.constant 5.000000e-01 : f32
    %49 = vector.broadcast %cst_39 : f32 to vector<1x8xf32>
    %50 = arith.cmpf ogt, %3, %49 : vector<1x8xf32>
    %cst_40 = arith.constant -1.000000e+09 : f32
    %51 = vector.shape_cast %50 : vector<1x8xi1> to vector<1x8xi1>
    %52 = vector.broadcast %51 : vector<1x8xi1> to vector<8x8xi1>
    %53 = vector.broadcast %cst_40 : f32 to vector<8x8xf32>
    %54 = arith.select %52, %53, %48 : vector<8x8xi1>, vector<8x8xf32>
    %cst_41 = arith.constant dense<0xFF800000> : vector<8xf32>
    %55 = vector.multi_reduction <maximumf>, %54, %cst_41 [1] : vector<8x8xf32> to vector<8xf32>
    %56 = vector.shape_cast %55 : vector<8xf32> to vector<8x1xf32>
    %57 = vector.broadcast %56 : vector<8x1xf32> to vector<8x8xf32>
    %58 = arith.subf %54, %57 : vector<8x8xf32>
    %59 = math.exp %58 : vector<8x8xf32>
    %cst_42 = arith.constant dense<0.000000e+00> : vector<8xf32>
    %60 = vector.multi_reduction <add>, %59, %cst_42 [1] : vector<8x8xf32> to vector<8xf32>
    %61 = vector.shape_cast %60 : vector<8xf32> to vector<8x1xf32>
    %62 = tpu.reciprocal %61 {approx = true} : vector<8x1xf32> -> vector<8x1xf32>
    %63 = vector.broadcast %62 : vector<8x1xf32> to vector<8x8xf32>
    %64 = arith.mulf %59, %63 : vector<8x8xf32>
    %65 = arith.truncf %64 : vector<8x8xf32> to vector<8x8xbf16>
    %66 = arith.truncf %43 : vector<8x8xf32> to vector<8x8xbf16>
    %cst_43 = arith.constant dense<0.000000e+00> : vector<8x8xf32>
    %67 = tpu.matmul %65, %66, %cst_43 {dimension_numbers = #tpu.dot_dimension_numbers<[1], [0], [0], [1], [0, 0, 1, 1], [], []>} : vector<8x8xbf16>, vector<8x8xbf16>, vector<8x8xf32> -> vector<8x8xf32>
    %c8 = arith.constant 8 : index
    %c0_44 = arith.constant 0 : index
    %68 = vector.load %arg6[%c8, %c0_44] : memref<32x32xf32, #tpu.memory_space<vmem>>, vector<8x32xf32>
    %69 = arith.truncf %67 : vector<8x8xf32> to vector<8x8xbf16>
    %70 = arith.truncf %68 : vector<8x32xf32> to vector<8x32xbf16>
    %cst_45 = arith.constant dense<0.000000e+00> : vector<8x32xf32>
    %71 = tpu.matmul %69, %70, %cst_45 {dimension_numbers = #tpu.dot_dimension_numbers<[1], [0], [0], [1], [0, 0, 1, 1], [], []>} : vector<8x8xbf16>, vector<8x32xbf16>, vector<8x32xf32> -> vector<8x32xf32>
    %72 = arith.addf %37, %71 : vector<8x32xf32>
    %c0_46 = arith.constant 0 : index
    %c2 = arith.constant 2 : index
    %c0_47 = arith.constant 0 : index
    %c0_48 = arith.constant 0 : index
    %73 = vector.load %arg1[%c0_46, %c2, %c0_47, %c0_48] : memref<1x4x8x8xf32, #tpu.memory_space<vmem>>, vector<1x1x8x8xf32>
    %74 = vector.shape_cast %73 : vector<1x1x8x8xf32> to vector<8x8xf32>
    %c0_49 = arith.constant 0 : index
    %c2_50 = arith.constant 2 : index
    %c0_51 = arith.constant 0 : index
    %c0_52 = arith.constant 0 : index
    %75 = vector.load %arg2[%c0_49, %c2_50, %c0_51, %c0_52] : memref<1x4x8x8xf32, #tpu.memory_space<vmem>>, vector<1x1x8x8xf32>
    %76 = vector.shape_cast %75 : vector<1x1x8x8xf32> to vector<8x8xf32>
    %c0_53 = arith.constant 0 : index
    %c2_54 = arith.constant 2 : index
    %c0_55 = arith.constant 0 : index
    %c0_56 = arith.constant 0 : index
    %77 = vector.load %arg3[%c0_53, %c2_54, %c0_55, %c0_56] : memref<1x4x8x8xf32, #tpu.memory_space<vmem>>, vector<1x1x8x8xf32>
    %78 = vector.shape_cast %77 : vector<1x1x8x8xf32> to vector<8x8xf32>
    %79 = arith.truncf %74 : vector<8x8xf32> to vector<8x8xbf16>
    %80 = arith.truncf %76 : vector<8x8xf32> to vector<8x8xbf16>
    %cst_57 = arith.constant dense<0.000000e+00> : vector<8x8xf32>
    %81 = tpu.matmul %79, %80, %cst_57 {dimension_numbers = #tpu.dot_dimension_numbers<[1], [1], [0], [0], [0, 0, 1, 0], [], []>} : vector<8x8xbf16>, vector<8x8xbf16>, vector<8x8xf32> -> vector<8x8xf32>
    %cst_58 = arith.constant 0.353553385 : f32
    %82 = vector.broadcast %cst_58 : f32 to vector<8x8xf32>
    %83 = arith.mulf %81, %82 : vector<8x8xf32>
    %cst_59 = arith.constant 5.000000e-01 : f32
    %84 = vector.broadcast %cst_59 : f32 to vector<1x8xf32>
    %85 = arith.cmpf ogt, %3, %84 : vector<1x8xf32>
    %cst_60 = arith.constant -1.000000e+09 : f32
    %86 = vector.shape_cast %85 : vector<1x8xi1> to vector<1x8xi1>
    %87 = vector.broadcast %86 : vector<1x8xi1> to vector<8x8xi1>
    %88 = vector.broadcast %cst_60 : f32 to vector<8x8xf32>
    %89 = arith.select %87, %88, %83 : vector<8x8xi1>, vector<8x8xf32>
    %cst_61 = arith.constant dense<0xFF800000> : vector<8xf32>
    %90 = vector.multi_reduction <maximumf>, %89, %cst_61 [1] : vector<8x8xf32> to vector<8xf32>
    %91 = vector.shape_cast %90 : vector<8xf32> to vector<8x1xf32>
    %92 = vector.broadcast %91 : vector<8x1xf32> to vector<8x8xf32>
    %93 = arith.subf %89, %92 : vector<8x8xf32>
    %94 = math.exp %93 : vector<8x8xf32>
    %cst_62 = arith.constant dense<0.000000e+00> : vector<8xf32>
    %95 = vector.multi_reduction <add>, %94, %cst_62 [1] : vector<8x8xf32> to vector<8xf32>
    %96 = vector.shape_cast %95 : vector<8xf32> to vector<8x1xf32>
    %97 = tpu.reciprocal %96 {approx = true} : vector<8x1xf32> -> vector<8x1xf32>
    %98 = vector.broadcast %97 : vector<8x1xf32> to vector<8x8xf32>
    %99 = arith.mulf %94, %98 : vector<8x8xf32>
    %100 = arith.truncf %99 : vector<8x8xf32> to vector<8x8xbf16>
    %101 = arith.truncf %78 : vector<8x8xf32> to vector<8x8xbf16>
    %cst_63 = arith.constant dense<0.000000e+00> : vector<8x8xf32>
    %102 = tpu.matmul %100, %101, %cst_63 {dimension_numbers = #tpu.dot_dimension_numbers<[1], [0], [0], [1], [0, 0, 1, 1], [], []>} : vector<8x8xbf16>, vector<8x8xbf16>, vector<8x8xf32> -> vector<8x8xf32>
    %c16 = arith.constant 16 : index
    %c0_64 = arith.constant 0 : index
    %103 = vector.load %arg6[%c16, %c0_64] : memref<32x32xf32, #tpu.memory_space<vmem>>, vector<8x32xf32>
    %104 = arith.truncf %102 : vector<8x8xf32> to vector<8x8xbf16>
    %105 = arith.truncf %103 : vector<8x32xf32> to vector<8x32xbf16>
    %cst_65 = arith.constant dense<0.000000e+00> : vector<8x32xf32>
    %106 = tpu.matmul %104, %105, %cst_65 {dimension_numbers = #tpu.dot_dimension_numbers<[1], [0], [0], [1], [0, 0, 1, 1], [], []>} : vector<8x8xbf16>, vector<8x32xbf16>, vector<8x32xf32> -> vector<8x32xf32>
    %107 = arith.addf %72, %106 : vector<8x32xf32>
    %c0_66 = arith.constant 0 : index
    %c3 = arith.constant 3 : index
    %c0_67 = arith.constant 0 : index
    %c0_68 = arith.constant 0 : index
    %108 = vector.load %arg1[%c0_66, %c3, %c0_67, %c0_68] : memref<1x4x8x8xf32, #tpu.memory_space<vmem>>, vector<1x1x8x8xf32>
    %109 = vector.shape_cast %108 : vector<1x1x8x8xf32> to vector<8x8xf32>
    %c0_69 = arith.constant 0 : index
    %c3_70 = arith.constant 3 : index
    %c0_71 = arith.constant 0 : index
    %c0_72 = arith.constant 0 : index
    %110 = vector.load %arg2[%c0_69, %c3_70, %c0_71, %c0_72] : memref<1x4x8x8xf32, #tpu.memory_space<vmem>>, vector<1x1x8x8xf32>
    %111 = vector.shape_cast %110 : vector<1x1x8x8xf32> to vector<8x8xf32>
    %c0_73 = arith.constant 0 : index
    %c3_74 = arith.constant 3 : index
    %c0_75 = arith.constant 0 : index
    %c0_76 = arith.constant 0 : index
    %112 = vector.load %arg3[%c0_73, %c3_74, %c0_75, %c0_76] : memref<1x4x8x8xf32, #tpu.memory_space<vmem>>, vector<1x1x8x8xf32>
    %113 = vector.shape_cast %112 : vector<1x1x8x8xf32> to vector<8x8xf32>
    %114 = arith.truncf %109 : vector<8x8xf32> to vector<8x8xbf16>
    %115 = arith.truncf %111 : vector<8x8xf32> to vector<8x8xbf16>
    %cst_77 = arith.constant dense<0.000000e+00> : vector<8x8xf32>
    %116 = tpu.matmul %114, %115, %cst_77 {dimension_numbers = #tpu.dot_dimension_numbers<[1], [1], [0], [0], [0, 0, 1, 0], [], []>} : vector<8x8xbf16>, vector<8x8xbf16>, vector<8x8xf32> -> vector<8x8xf32>
    %cst_78 = arith.constant 0.353553385 : f32
    %117 = vector.broadcast %cst_78 : f32 to vector<8x8xf32>
    %118 = arith.mulf %116, %117 : vector<8x8xf32>
    %cst_79 = arith.constant 5.000000e-01 : f32
    %119 = vector.broadcast %cst_79 : f32 to vector<1x8xf32>
    %120 = arith.cmpf ogt, %3, %119 : vector<1x8xf32>
    %cst_80 = arith.constant -1.000000e+09 : f32
    %121 = vector.shape_cast %120 : vector<1x8xi1> to vector<1x8xi1>
    %122 = vector.broadcast %121 : vector<1x8xi1> to vector<8x8xi1>
    %123 = vector.broadcast %cst_80 : f32 to vector<8x8xf32>
    %124 = arith.select %122, %123, %118 : vector<8x8xi1>, vector<8x8xf32>
    %cst_81 = arith.constant dense<0xFF800000> : vector<8xf32>
    %125 = vector.multi_reduction <maximumf>, %124, %cst_81 [1] : vector<8x8xf32> to vector<8xf32>
    %126 = vector.shape_cast %125 : vector<8xf32> to vector<8x1xf32>
    %127 = vector.broadcast %126 : vector<8x1xf32> to vector<8x8xf32>
    %128 = arith.subf %124, %127 : vector<8x8xf32>
    %129 = math.exp %128 : vector<8x8xf32>
    %cst_82 = arith.constant dense<0.000000e+00> : vector<8xf32>
    %130 = vector.multi_reduction <add>, %129, %cst_82 [1] : vector<8x8xf32> to vector<8xf32>
    %131 = vector.shape_cast %130 : vector<8xf32> to vector<8x1xf32>
    %132 = tpu.reciprocal %131 {approx = true} : vector<8x1xf32> -> vector<8x1xf32>
    %133 = vector.broadcast %132 : vector<8x1xf32> to vector<8x8xf32>
    %134 = arith.mulf %129, %133 : vector<8x8xf32>
    %135 = arith.truncf %134 : vector<8x8xf32> to vector<8x8xbf16>
    %136 = arith.truncf %113 : vector<8x8xf32> to vector<8x8xbf16>
    %cst_83 = arith.constant dense<0.000000e+00> : vector<8x8xf32>
    %137 = tpu.matmul %135, %136, %cst_83 {dimension_numbers = #tpu.dot_dimension_numbers<[1], [0], [0], [1], [0, 0, 1, 1], [], []>} : vector<8x8xbf16>, vector<8x8xbf16>, vector<8x8xf32> -> vector<8x8xf32>
    %c24 = arith.constant 24 : index
    %c0_84 = arith.constant 0 : index
    %138 = vector.load %arg6[%c24, %c0_84] : memref<32x32xf32, #tpu.memory_space<vmem>>, vector<8x32xf32>
    %139 = arith.truncf %137 : vector<8x8xf32> to vector<8x8xbf16>
    %140 = arith.truncf %138 : vector<8x32xf32> to vector<8x32xbf16>
    %cst_85 = arith.constant dense<0.000000e+00> : vector<8x32xf32>
    %141 = tpu.matmul %139, %140, %cst_85 {dimension_numbers = #tpu.dot_dimension_numbers<[1], [0], [0], [1], [0, 0, 1, 1], [], []>} : vector<8x8xbf16>, vector<8x32xbf16>, vector<8x32xf32> -> vector<8x32xf32>
    %142 = arith.addf %107, %141 : vector<8x32xf32>
    %c0_86 = arith.constant 0 : index
    %c0_87 = arith.constant 0 : index
    %143 = vector.load %arg7[%c0_86, %c0_87] : memref<1x32xf32, #tpu.memory_space<vmem>>, vector<1x32xf32>
    %144 = vector.broadcast %143 : vector<1x32xf32> to vector<8x32xf32>
    %145 = arith.addf %142, %144 : vector<8x32xf32>
    %146 = arith.addf %145, %1 : vector<8x32xf32>
    %c0_88 = arith.constant 0 : index
    %c0_89 = arith.constant 0 : index
    %147 = vector.load %arg8[%c0_88, %c0_89] : memref<1x32xf32, #tpu.memory_space<vmem>>, vector<1x32xf32>
    %c0_90 = arith.constant 0 : index
    %c0_91 = arith.constant 0 : index
    %148 = vector.load %arg9[%c0_90, %c0_91] : memref<1x32xf32, #tpu.memory_space<vmem>>, vector<1x32xf32>
    %cst_92 = arith.constant dense<0.000000e+00> : vector<8xf32>
    %149 = vector.multi_reduction <add>, %146, %cst_92 [1] : vector<8x32xf32> to vector<8xf32>
    %150 = vector.shape_cast %149 : vector<8xf32> to vector<8x1xf32>
    %cst_93 = arith.constant 3.200000e+01 : f32
    %151 = vector.broadcast %cst_93 : f32 to vector<8x1xf32>
    %152 = arith.divf %150, %151 : vector<8x1xf32>
    %153 = vector.broadcast %152 : vector<8x1xf32> to vector<8x32xf32>
    %154 = arith.subf %146, %153 : vector<8x32xf32>
    %155 = arith.mulf %154, %154 : vector<8x32xf32>
    %cst_94 = arith.constant dense<0.000000e+00> : vector<8xf32>
    %156 = vector.multi_reduction <add>, %155, %cst_94 [1] : vector<8x32xf32> to vector<8xf32>
    %157 = vector.shape_cast %156 : vector<8xf32> to vector<8x1xf32>
    %cst_95 = arith.constant 3.200000e+01 : f32
    %158 = vector.broadcast %cst_95 : f32 to vector<8x1xf32>
    %159 = arith.divf %157, %158 : vector<8x1xf32>
    %160 = vector.broadcast %152 : vector<8x1xf32> to vector<8x32xf32>
    %161 = arith.subf %146, %160 : vector<8x32xf32>
    %cst_96 = arith.constant 9.99999974E-6 : f32
    %162 = vector.broadcast %cst_96 : f32 to vector<8x1xf32>
    %163 = arith.addf %159, %162 : vector<8x1xf32>
    %164 = math.rsqrt %163 : vector<8x1xf32>
    %165 = vector.broadcast %164 : vector<8x1xf32> to vector<8x32xf32>
    %166 = arith.mulf %161, %165 : vector<8x32xf32>
    %167 = vector.broadcast %147 : vector<1x32xf32> to vector<8x32xf32>
    %168 = arith.mulf %166, %167 : vector<8x32xf32>
    %169 = vector.broadcast %148 : vector<1x32xf32> to vector<8x32xf32>
    %170 = arith.addf %168, %169 : vector<8x32xf32>
    %cst_97 = arith.constant dense<0.000000e+00> : vector<32xf32>
    %171 = vector.multi_reduction <add>, %170, %cst_97 [0] : vector<8x32xf32> to vector<32xf32>
    %172 = vector.shape_cast %171 : vector<32xf32> to vector<1x32xf32>
    %cst_98 = arith.constant 8.000000e+00 : f32
    %173 = vector.broadcast %cst_98 : f32 to vector<1x32xf32>
    %174 = arith.divf %172, %173 : vector<1x32xf32>
    %c0_99 = arith.constant 0 : index
    %c0_100 = arith.constant 0 : index
    %c0_101 = arith.constant 0 : index
    %175 = vector.load %arg10[%c0_99, %c0_100, %c0_101] : memref<1x1x32xf32, #tpu.memory_space<vmem>>, vector<1x1x32xf32>
    %176 = vector.shape_cast %175 : vector<1x1x32xf32> to vector<1x32xf32>
    %177 = vector.shape_cast %174 : vector<1x32xf32> to vector<1x1x32xf32>
    tpu.vector_store %arg10[%c0_99, %c0_100, %c0_101], %177 {strides = array<i32>} : memref<1x1x32xf32, #tpu.memory_space<vmem>>, vector<1x1x32xf32>,
    return
  }
  func.func @transform_0(%arg0: i32) -> (i32, i32, i32, i32) {
    %c0_i32 = arith.constant 0 : i32
    %c0_i32_0 = arith.constant 0 : i32
    %c0_i32_1 = arith.constant 0 : i32
    %c0_i32_2 = arith.constant 0 : i32
    return %arg0, %c0_i32, %c0_i32_0, %c0_i32_1 : i32, i32, i32, i32
  }
  func.func @transform_1(%arg0: i32) -> (i32, i32, i32, i32) {
    %c0_i32 = arith.constant 0 : i32
    %c0_i32_0 = arith.constant 0 : i32
    %c0_i32_1 = arith.constant 0 : i32
    %c0_i32_2 = arith.constant 0 : i32
    return %arg0, %c0_i32, %c0_i32_0, %c0_i32_1 : i32, i32, i32, i32
  }
  func.func @transform_2(%arg0: i32) -> (i32, i32, i32, i32) {
    %c0_i32 = arith.constant 0 : i32
    %c0_i32_0 = arith.constant 0 : i32
    %c0_i32_1 = arith.constant 0 : i32
    %c0_i32_2 = arith.constant 0 : i32
    return %arg0, %c0_i32, %c0_i32_0, %c0_i32_1 : i32, i32, i32, i32
  }
  func.func @transform_3(%arg0: i32) -> (i32, i32, i32) {
    %c0_i32 = arith.constant 0 : i32
    %c0_i32_0 = arith.constant 0 : i32
    %c0_i32_1 = arith.constant 0 : i32
    return %arg0, %c0_i32, %c0_i32_0 : i32, i32, i32
  }
  func.func @transform_4(%arg0: i32) -> (i32, i32, i32) {
    %c0_i32 = arith.constant 0 : i32
    %c0_i32_0 = arith.constant 0 : i32
    %c0_i32_1 = arith.constant 0 : i32
    return %arg0, %c0_i32, %c0_i32_0 : i32, i32, i32
  }
  func.func @transform_5(%arg0: i32) -> (i32, i32) {
    %c0_i32 = arith.constant 0 : i32
    %c0_i32_0 = arith.constant 0 : i32
    %c0_i32_1 = arith.constant 0 : i32
    return %c0_i32, %c0_i32_0 : i32, i32
  }
  func.func @transform_6(%arg0: i32) -> (i32, i32) {
    %c0_i32 = arith.constant 0 : i32
    %c0_i32_0 = arith.constant 0 : i32
    %c0_i32_1 = arith.constant 0 : i32
    return %c0_i32, %c0_i32_0 : i32, i32
  }
  func.func @transform_7(%arg0: i32) -> (i32, i32) {
    %c0_i32 = arith.constant 0 : i32
    %c0_i32_0 = arith.constant 0 : i32
    %c0_i32_1 = arith.constant 0 : i32
    return %c0_i32, %c0_i32_0 : i32, i32
  }
  func.func @transform_8(%arg0: i32) -> (i32, i32) {
    %c0_i32 = arith.constant 0 : i32
    %c0_i32_0 = arith.constant 0 : i32
    %c0_i32_1 = arith.constant 0 : i32
    return %c0_i32, %c0_i32_0 : i32, i32
  }
  func.func @transform_9(%arg0: i32) -> (i32, i32, i32) {
    %c0_i32 = arith.constant 0 : i32
    %c0_i32_0 = arith.constant 0 : i32
    %c0_i32_1 = arith.constant 0 : i32
    return %arg0, %c0_i32, %c0_i32_0 : i32, i32, i32
  }
}

module attributes {stable_mosaic.version = 11 : i64} {
  func.func @_conv_block_kernel(%arg0: i32, %arg1: memref<1x10x32xf32, #tpu.memory_space<vmem>>, %arg2: memref<96x64xf32, #tpu.memory_space<vmem>>, %arg3: memref<1x64xf32, #tpu.memory_space<vmem>>, %arg4: memref<64x32xf32, #tpu.memory_space<vmem>>, %arg5: memref<1x32xf32, #tpu.memory_space<vmem>>, %arg6: memref<1x1x32xf32, #tpu.memory_space<vmem>>) attributes {dimension_semantics = [#tpu.dimension_semantics<parallel>], iteration_bounds = array<i64: 2>, scalar_prefetch = 0 : i64, scratch_operands = 0 : i64, tpu.core_type = #tpu.core_type<tc>, window_params = [{transform_indices = @transform_0, window_bounds = array<i64: 1, 10, 32>}, {pipeline_mode = #tpu.pipeline_mode<synchronous>, transform_indices = @transform_1, window_bounds = array<i64: 96, 64>}, {pipeline_mode = #tpu.pipeline_mode<synchronous>, transform_indices = @transform_2, window_bounds = array<i64: 1, 64>}, {pipeline_mode = #tpu.pipeline_mode<synchronous>, transform_indices = @transform_3, window_bounds = array<i64: 64, 32>}, {pipeline_mode = #tpu.pipeline_mode<synchronous>, transform_indices = @transform_4, window_bounds = array<i64: 1, 32>}, {transform_indices = @transform_5, window_bounds = array<i64: 1, 1, 32>}]} {
    %c0 = arith.constant 0 : index
    %c0_0 = arith.constant 0 : index
    %c0_1 = arith.constant 0 : index
    %0 = vector.load %arg1[%c0, %c0_0, %c0_1] : memref<1x10x32xf32, #tpu.memory_space<vmem>>, vector<1x8x32xf32>
    %1 = vector.shape_cast %0 : vector<1x8x32xf32> to vector<8x32xf32>
    %c0_2 = arith.constant 0 : index
    %c1 = arith.constant 1 : index
    %c0_3 = arith.constant 0 : index
    %2 = vector.load %arg1[%c0_2, %c1, %c0_3] : memref<1x10x32xf32, #tpu.memory_space<vmem>>, vector<1x8x32xf32>
    %3 = vector.shape_cast %2 : vector<1x8x32xf32> to vector<8x32xf32>
    %c0_4 = arith.constant 0 : index
    %c2 = arith.constant 2 : index
    %c0_5 = arith.constant 0 : index
    %4 = vector.load %arg1[%c0_4, %c2, %c0_5] : memref<1x10x32xf32, #tpu.memory_space<vmem>>, vector<1x8x32xf32>
    %5 = vector.shape_cast %4 : vector<1x8x32xf32> to vector<8x32xf32>
    %c0_6 = arith.constant 0 : index
    %c0_7 = arith.constant 0 : index
    %6 = vector.load %arg2[%c0_6, %c0_7] : memref<96x64xf32, #tpu.memory_space<vmem>>, vector<32x64xf32>
    %7 = arith.truncf %1 : vector<8x32xf32> to vector<8x32xbf16>
    %8 = arith.truncf %6 : vector<32x64xf32> to vector<32x64xbf16>
    %cst = arith.constant dense<0.000000e+00> : vector<8x64xf32>
    %9 = tpu.matmul %7, %8, %cst {dimension_numbers = #tpu.dot_dimension_numbers<[1], [0], [0], [1], [0, 0, 1, 1], [], []>} : vector<8x32xbf16>, vector<32x64xbf16>, vector<8x64xf32> -> vector<8x64xf32>
    %c32 = arith.constant 32 : index
    %c0_8 = arith.constant 0 : index
    %10 = vector.load %arg2[%c32, %c0_8] : memref<96x64xf32, #tpu.memory_space<vmem>>, vector<32x64xf32>
    %11 = arith.truncf %3 : vector<8x32xf32> to vector<8x32xbf16>
    %12 = arith.truncf %10 : vector<32x64xf32> to vector<32x64xbf16>
    %cst_9 = arith.constant dense<0.000000e+00> : vector<8x64xf32>
    %13 = tpu.matmul %11, %12, %cst_9 {dimension_numbers = #tpu.dot_dimension_numbers<[1], [0], [0], [1], [0, 0, 1, 1], [], []>} : vector<8x32xbf16>, vector<32x64xbf16>, vector<8x64xf32> -> vector<8x64xf32>
    %14 = arith.addf %9, %13 : vector<8x64xf32>
    %c64 = arith.constant 64 : index
    %c0_10 = arith.constant 0 : index
    %15 = vector.load %arg2[%c64, %c0_10] : memref<96x64xf32, #tpu.memory_space<vmem>>, vector<32x64xf32>
    %16 = arith.truncf %5 : vector<8x32xf32> to vector<8x32xbf16>
    %17 = arith.truncf %15 : vector<32x64xf32> to vector<32x64xbf16>
    %cst_11 = arith.constant dense<0.000000e+00> : vector<8x64xf32>
    %18 = tpu.matmul %16, %17, %cst_11 {dimension_numbers = #tpu.dot_dimension_numbers<[1], [0], [0], [1], [0, 0, 1, 1], [], []>} : vector<8x32xbf16>, vector<32x64xbf16>, vector<8x64xf32> -> vector<8x64xf32>
    %19 = arith.addf %14, %18 : vector<8x64xf32>
    %c0_12 = arith.constant 0 : index
    %c0_13 = arith.constant 0 : index
    %20 = vector.load %arg3[%c0_12, %c0_13] : memref<1x64xf32, #tpu.memory_space<vmem>>, vector<1x64xf32>
    %21 = vector.broadcast %20 : vector<1x64xf32> to vector<8x64xf32>
    %22 = arith.addf %19, %21 : vector<8x64xf32>
    %cst_14 = arith.constant 0.000000e+00 : f32
    %23 = vector.broadcast %cst_14 : f32 to vector<8x64xf32>
    %24 = arith.cmpf oge, %22, %23 : vector<8x64xf32>
    %cst_15 = arith.constant 0.00999999977 : f32
    %25 = vector.broadcast %cst_15 : f32 to vector<8x64xf32>
    %26 = arith.mulf %25, %22 : vector<8x64xf32>
    %27 = arith.select %24, %22, %26 : vector<8x64xi1>, vector<8x64xf32>
    %c0_16 = arith.constant 0 : index
    %c0_17 = arith.constant 0 : index
    %28 = vector.load %arg4[%c0_16, %c0_17] : memref<64x32xf32, #tpu.memory_space<vmem>>, vector<64x32xf32>
    %29 = arith.truncf %27 : vector<8x64xf32> to vector<8x64xbf16>
    %30 = arith.truncf %28 : vector<64x32xf32> to vector<64x32xbf16>
    %cst_18 = arith.constant dense<0.000000e+00> : vector<8x32xf32>
    %31 = tpu.matmul %29, %30, %cst_18 {dimension_numbers = #tpu.dot_dimension_numbers<[1], [0], [0], [1], [0, 0, 1, 1], [], []>} : vector<8x64xbf16>, vector<64x32xbf16>, vector<8x32xf32> -> vector<8x32xf32>
    %c0_19 = arith.constant 0 : index
    %c0_20 = arith.constant 0 : index
    %32 = vector.load %arg5[%c0_19, %c0_20] : memref<1x32xf32, #tpu.memory_space<vmem>>, vector<1x32xf32>
    %33 = vector.broadcast %32 : vector<1x32xf32> to vector<8x32xf32>
    %34 = arith.addf %31, %33 : vector<8x32xf32>
    %35 = arith.addf %34, %3 : vector<8x32xf32>
    %cst_21 = arith.constant dense<0.000000e+00> : vector<32xf32>
    %36 = vector.multi_reduction <add>, %35, %cst_21 [0] : vector<8x32xf32> to vector<32xf32>
    %37 = vector.shape_cast %36 : vector<32xf32> to vector<1x32xf32>
    %cst_22 = arith.constant 8.000000e+00 : f32
    %38 = vector.broadcast %cst_22 : f32 to vector<1x32xf32>
    %39 = arith.divf %37, %38 : vector<1x32xf32>
    %c0_23 = arith.constant 0 : index
    %c0_24 = arith.constant 0 : index
    %c0_25 = arith.constant 0 : index
    %40 = vector.load %arg6[%c0_23, %c0_24, %c0_25] : memref<1x1x32xf32, #tpu.memory_space<vmem>>, vector<1x1x32xf32>
    %41 = vector.shape_cast %40 : vector<1x1x32xf32> to vector<1x32xf32>
    %42 = vector.shape_cast %39 : vector<1x32xf32> to vector<1x1x32xf32>
    tpu.vector_store %arg6[%c0_23, %c0_24, %c0_25], %42 {strides = array<i32>} : memref<1x1x32xf32, #tpu.memory_space<vmem>>, vector<1x1x32xf32>,
    return
  }
  func.func @transform_0(%arg0: i32) -> (i32, i32, i32) {
    %c0_i32 = arith.constant 0 : i32
    %c0_i32_0 = arith.constant 0 : i32
    %c0_i32_1 = arith.constant 0 : i32
    return %arg0, %c0_i32, %c0_i32_0 : i32, i32, i32
  }
  func.func @transform_1(%arg0: i32) -> (i32, i32) {
    %c0_i32 = arith.constant 0 : i32
    %c0_i32_0 = arith.constant 0 : i32
    %c0_i32_1 = arith.constant 0 : i32
    return %c0_i32, %c0_i32_0 : i32, i32
  }
  func.func @transform_2(%arg0: i32) -> (i32, i32) {
    %c0_i32 = arith.constant 0 : i32
    %c0_i32_0 = arith.constant 0 : i32
    %c0_i32_1 = arith.constant 0 : i32
    return %c0_i32, %c0_i32_0 : i32, i32
  }
  func.func @transform_3(%arg0: i32) -> (i32, i32) {
    %c0_i32 = arith.constant 0 : i32
    %c0_i32_0 = arith.constant 0 : i32
    %c0_i32_1 = arith.constant 0 : i32
    return %c0_i32, %c0_i32_0 : i32, i32
  }
  func.func @transform_4(%arg0: i32) -> (i32, i32) {
    %c0_i32 = arith.constant 0 : i32
    %c0_i32_0 = arith.constant 0 : i32
    %c0_i32_1 = arith.constant 0 : i32
    return %c0_i32, %c0_i32_0 : i32, i32
  }
  func.func @transform_5(%arg0: i32) -> (i32, i32, i32) {
    %c0_i32 = arith.constant 0 : i32
    %c0_i32_0 = arith.constant 0 : i32
    %c0_i32_1 = arith.constant 0 : i32
    return %arg0, %c0_i32, %c0_i32_0 : i32, i32, i32
  }
}

module attributes {stable_mosaic.version = 11 : i64} {
  func.func @_bilstm_head_kernel(%arg0: i32, %arg1: memref<16x32xf32, #tpu.memory_space<vmem>>, %arg2: memref<32x64xf32, #tpu.memory_space<vmem>>, %arg3: memref<16x64xf32, #tpu.memory_space<vmem>>, %arg4: memref<1x64xf32, #tpu.memory_space<vmem>>, %arg5: memref<32x64xf32, #tpu.memory_space<vmem>>, %arg6: memref<16x64xf32, #tpu.memory_space<vmem>>, %arg7: memref<1x64xf32, #tpu.memory_space<vmem>>, %arg8: memref<16x32xf32, #tpu.memory_space<vmem>>, %arg9: memref<2x16xf32, #tpu.memory_space<vmem>>, %arg10: memref<32x32xf32, #tpu.memory_space<vmem>>, %arg11: memref<1x32xf32, #tpu.memory_space<vmem>>, %arg12: memref<1x32xf32, #tpu.memory_space<vmem>>, %arg13: memref<1x32xf32, #tpu.memory_space<vmem>>, %arg14: memref<2x32xf32, #tpu.memory_space<vmem>>, %arg15: memref<16x64xf32, #tpu.memory_space<vmem>>, %arg16: memref<16x64xf32, #tpu.memory_space<vmem>>, %arg17: memref<16x16xf32, #tpu.memory_space<vmem>>, %arg18: memref<16x16xf32, #tpu.memory_space<vmem>>) attributes {dimension_semantics = [#tpu.dimension_semantics<arbitrary>], iteration_bounds = array<i64: 1>, scalar_prefetch = 0 : i64, scratch_operands = 4 : i64, tpu.core_type = #tpu.core_type<tc>, window_params = [{pipeline_mode = #tpu.pipeline_mode<synchronous>, transform_indices = @transform_0, window_bounds = array<i64: 16, 32>}, {pipeline_mode = #tpu.pipeline_mode<synchronous>, transform_indices = @transform_1, window_bounds = array<i64: 32, 64>}, {pipeline_mode = #tpu.pipeline_mode<synchronous>, transform_indices = @transform_2, window_bounds = array<i64: 16, 64>}, {pipeline_mode = #tpu.pipeline_mode<synchronous>, transform_indices = @transform_3, window_bounds = array<i64: 1, 64>}, {pipeline_mode = #tpu.pipeline_mode<synchronous>, transform_indices = @transform_4, window_bounds = array<i64: 32, 64>}, {pipeline_mode = #tpu.pipeline_mode<synchronous>, transform_indices = @transform_5, window_bounds = array<i64: 16, 64>}, {pipeline_mode = #tpu.pipeline_mode<synchronous>, transform_indices = @transform_6, window_bounds = array<i64: 1, 64>}, {pipeline_mode = #tpu.pipeline_mode<synchronous>, transform_indices = @transform_7, window_bounds = array<i64: 16, 32>}, {pipeline_mode = #tpu.pipeline_mode<synchronous>, transform_indices = @transform_8, window_bounds = array<i64: 2, 16>}, {pipeline_mode = #tpu.pipeline_mode<synchronous>, transform_indices = @transform_9, window_bounds = array<i64: 32, 32>}, {pipeline_mode = #tpu.pipeline_mode<synchronous>, transform_indices = @transform_10, window_bounds = array<i64: 1, 32>}, {pipeline_mode = #tpu.pipeline_mode<synchronous>, transform_indices = @transform_11, window_bounds = array<i64: 1, 32>}, {pipeline_mode = #tpu.pipeline_mode<synchronous>, transform_indices = @transform_12, window_bounds = array<i64: 1, 32>}, {pipeline_mode = #tpu.pipeline_mode<synchronous>, transform_indices = @transform_13, window_bounds = array<i64: 2, 32>}]} {
    %c0 = arith.constant 0 : index
    %c0_0 = arith.constant 0 : index
    %0 = vector.load %arg1[%c0, %c0_0] : memref<16x32xf32, #tpu.memory_space<vmem>>, vector<16x32xf32>
    %c0_1 = arith.constant 0 : index
    %c0_2 = arith.constant 0 : index
    %1 = vector.load %arg2[%c0_1, %c0_2] : memref<32x64xf32, #tpu.memory_space<vmem>>, vector<32x64xf32>
    %2 = arith.truncf %0 : vector<16x32xf32> to vector<16x32xbf16>
    %3 = arith.truncf %1 : vector<32x64xf32> to vector<32x64xbf16>
    %cst = arith.constant dense<0.000000e+00> : vector<16x64xf32>
    %4 = tpu.matmul %2, %3, %cst {dimension_numbers = #tpu.dot_dimension_numbers<[1], [0], [0], [1], [0, 0, 1, 1], [], []>} : vector<16x32xbf16>, vector<32x64xbf16>, vector<16x64xf32> -> vector<16x64xf32>
    %c0_3 = arith.constant 0 : index
    %c0_4 = arith.constant 0 : index
    %5 = vector.load %arg4[%c0_3, %c0_4] : memref<1x64xf32, #tpu.memory_space<vmem>>, vector<1x64xf32>
    %6 = vector.broadcast %5 : vector<1x64xf32> to vector<16x64xf32>
    %7 = arith.addf %4, %6 : vector<16x64xf32>
    %c0_5 = arith.constant 0 : index
    %c0_6 = arith.constant 0 : index
    %8 = vector.load %arg15[%c0_5, %c0_6] : memref<16x64xf32, #tpu.memory_space<vmem>>, vector<16x64xf32>
    tpu.vector_store %arg15[%c0_5, %c0_6], %7 {strides = array<i32>} : memref<16x64xf32, #tpu.memory_space<vmem>>, vector<16x64xf32>,
    %c0_7 = arith.constant 0 : index
    %c0_8 = arith.constant 0 : index
    %9 = vector.load %arg5[%c0_7, %c0_8] : memref<32x64xf32, #tpu.memory_space<vmem>>, vector<32x64xf32>
    %10 = arith.truncf %0 : vector<16x32xf32> to vector<16x32xbf16>
    %11 = arith.truncf %9 : vector<32x64xf32> to vector<32x64xbf16>
    %cst_9 = arith.constant dense<0.000000e+00> : vector<16x64xf32>
    %12 = tpu.matmul %10, %11, %cst_9 {dimension_numbers = #tpu.dot_dimension_numbers<[1], [0], [0], [1], [0, 0, 1, 1], [], []>} : vector<16x32xbf16>, vector<32x64xbf16>, vector<16x64xf32> -> vector<16x64xf32>
    %c0_10 = arith.constant 0 : index
    %c0_11 = arith.constant 0 : index
    %13 = vector.load %arg7[%c0_10, %c0_11] : memref<1x64xf32, #tpu.memory_space<vmem>>, vector<1x64xf32>
    %14 = vector.broadcast %13 : vector<1x64xf32> to vector<16x64xf32>
    %15 = arith.addf %12, %14 : vector<16x64xf32>
    %c0_12 = arith.constant 0 : index
    %c0_13 = arith.constant 0 : index
    %16 = vector.load %arg16[%c0_12, %c0_13] : memref<16x64xf32, #tpu.memory_space<vmem>>, vector<16x64xf32>
    tpu.vector_store %arg16[%c0_12, %c0_13], %15 {strides = array<i32>} : memref<16x64xf32, #tpu.memory_space<vmem>>, vector<16x64xf32>,
    %cst_14 = arith.constant 0.000000e+00 : f32
    %17 = vector.broadcast %cst_14 : f32 to vector<2x16xf32>
    %c0_i32 = arith.constant 0 : i32
    %c8_i32 = arith.constant 8 : i32
    %18 = arith.addi %c0_i32, %c8_i32 : i32
    %c1_i32 = arith.constant 1 : i32
    %19:2 = scf.for %arg19 = %c0_i32 to %18 step %c1_i32 iter_args(%arg20 = %17, %arg21 = %17) -> (vector<2x16xf32>, vector<2x16xf32>)  : i32 {
      %c2_i32 = arith.constant 2 : i32
      %65 = arith.muli %arg19, %c2_i32 : i32
      %66 = arith.index_cast %65 : i32 to index
      %c0_47 = arith.constant 0 : index
      %67 = vector.load %arg15[%66, %c0_47] : memref<16x64xf32, #tpu.memory_space<vmem>>, vector<2x64xf32>
      %c0_48 = arith.constant 0 : index
      %c0_49 = arith.constant 0 : index
      %68 = vector.load %arg3[%c0_48, %c0_49] : memref<16x64xf32, #tpu.memory_space<vmem>>, vector<16x64xf32>
      %69 = arith.truncf %arg20 : vector<2x16xf32> to vector<2x16xbf16>
      %70 = arith.truncf %68 : vector<16x64xf32> to vector<16x64xbf16>
      %cst_50 = arith.constant dense<0.000000e+00> : vector<2x64xf32>
      %71 = tpu.matmul %69, %70, %cst_50 {dimension_numbers = #tpu.dot_dimension_numbers<[1], [0], [0], [1], [0, 0, 1, 1], [], []>} : vector<2x16xbf16>, vector<16x64xbf16>, vector<2x64xf32> -> vector<2x64xf32>
      %72 = arith.addf %67, %71 : vector<2x64xf32>
      %73 = vector.extract_strided_slice %72 {offsets = [0, 0], sizes = [2, 16], strides = [1, 1]} : vector<2x64xf32> to vector<2x16xf32>
      %74 = arith.negf %73 : vector<2x16xf32>
      %75 = math.exp %74 : vector<2x16xf32>
      %cst_51 = arith.constant 1.000000e+00 : f32
      %76 = vector.broadcast %cst_51 : f32 to vector<2x16xf32>
      %77 = arith.addf %76, %75 : vector<2x16xf32>
      %78 = arith.divf %76, %77 : vector<2x16xf32>
      %79 = vector.extract_strided_slice %72 {offsets = [0, 16], sizes = [2, 16], strides = [1, 1]} : vector<2x64xf32> to vector<2x16xf32>
      %80 = arith.negf %79 : vector<2x16xf32>
      %81 = math.exp %80 : vector<2x16xf32>
      %cst_52 = arith.constant 1.000000e+00 : f32
      %82 = vector.broadcast %cst_52 : f32 to vector<2x16xf32>
      %83 = arith.addf %82, %81 : vector<2x16xf32>
      %84 = arith.divf %82, %83 : vector<2x16xf32>
      %85 = vector.extract_strided_slice %72 {offsets = [0, 32], sizes = [2, 16], strides = [1, 1]} : vector<2x64xf32> to vector<2x16xf32>
      %86 = math.tanh %85 : vector<2x16xf32>
      %87 = vector.extract_strided_slice %72 {offsets = [0, 48], sizes = [2, 16], strides = [1, 1]} : vector<2x64xf32> to vector<2x16xf32>
      %88 = arith.negf %87 : vector<2x16xf32>
      %89 = math.exp %88 : vector<2x16xf32>
      %cst_53 = arith.constant 1.000000e+00 : f32
      %90 = vector.broadcast %cst_53 : f32 to vector<2x16xf32>
      %91 = arith.addf %90, %89 : vector<2x16xf32>
      %92 = arith.divf %90, %91 : vector<2x16xf32>
      %93 = arith.mulf %84, %arg21 : vector<2x16xf32>
      %94 = arith.mulf %78, %86 : vector<2x16xf32>
      %95 = arith.addf %93, %94 : vector<2x16xf32>
      %96 = math.tanh %95 : vector<2x16xf32>
      %97 = arith.mulf %92, %96 : vector<2x16xf32>
      %c2_i32_54 = arith.constant 2 : i32
      %98 = arith.muli %arg19, %c2_i32_54 : i32
      %99 = arith.index_cast %98 : i32 to index
      %c0_55 = arith.constant 0 : index
      %100 = vector.load %arg17[%99, %c0_55] : memref<16x16xf32, #tpu.memory_space<vmem>>, vector<2x16xf32>
      tpu.vector_store %arg17[%99, %c0_55], %97 {strides = array<i32>} : memref<16x16xf32, #tpu.memory_space<vmem>>, vector<2x16xf32>,
      scf.yield %97, %95 : vector<2x16xf32>, vector<2x16xf32>
    }
    %c8_i32_15 = arith.constant 8 : i32
    %c0_i32_16 = arith.constant 0 : i32
    %c8_i32_17 = arith.constant 8 : i32
    %20 = arith.addi %c0_i32_16, %c8_i32_17 : i32
    %c1_i32_18 = arith.constant 1 : i32
    %21:2 = scf.for %arg19 = %c0_i32_16 to %20 step %c1_i32_18 iter_args(%arg20 = %17, %arg21 = %17) -> (vector<2x16xf32>, vector<2x16xf32>)  : i32 {
      %c7_i32 = arith.constant 7 : i32
      %65 = arith.subi %c7_i32, %arg19 : i32
      %c2_i32 = arith.constant 2 : i32
      %66 = arith.muli %65, %c2_i32 : i32
      %67 = arith.index_cast %66 : i32 to index
      %c0_47 = arith.constant 0 : index
      %68 = vector.load %arg16[%67, %c0_47] : memref<16x64xf32, #tpu.memory_space<vmem>>, vector<2x64xf32>
      %c0_48 = arith.constant 0 : index
      %c0_49 = arith.constant 0 : index
      %69 = vector.load %arg6[%c0_48, %c0_49] : memref<16x64xf32, #tpu.memory_space<vmem>>, vector<16x64xf32>
      %70 = arith.truncf %arg20 : vector<2x16xf32> to vector<2x16xbf16>
      %71 = arith.truncf %69 : vector<16x64xf32> to vector<16x64xbf16>
      %cst_50 = arith.constant dense<0.000000e+00> : vector<2x64xf32>
      %72 = tpu.matmul %70, %71, %cst_50 {dimension_numbers = #tpu.dot_dimension_numbers<[1], [0], [0], [1], [0, 0, 1, 1], [], []>} : vector<2x16xbf16>, vector<16x64xbf16>, vector<2x64xf32> -> vector<2x64xf32>
      %73 = arith.addf %68, %72 : vector<2x64xf32>
      %74 = vector.extract_strided_slice %73 {offsets = [0, 0], sizes = [2, 16], strides = [1, 1]} : vector<2x64xf32> to vector<2x16xf32>
      %75 = arith.negf %74 : vector<2x16xf32>
      %76 = math.exp %75 : vector<2x16xf32>
      %cst_51 = arith.constant 1.000000e+00 : f32
      %77 = vector.broadcast %cst_51 : f32 to vector<2x16xf32>
      %78 = arith.addf %77, %76 : vector<2x16xf32>
      %79 = arith.divf %77, %78 : vector<2x16xf32>
      %80 = vector.extract_strided_slice %73 {offsets = [0, 16], sizes = [2, 16], strides = [1, 1]} : vector<2x64xf32> to vector<2x16xf32>
      %81 = arith.negf %80 : vector<2x16xf32>
      %82 = math.exp %81 : vector<2x16xf32>
      %cst_52 = arith.constant 1.000000e+00 : f32
      %83 = vector.broadcast %cst_52 : f32 to vector<2x16xf32>
      %84 = arith.addf %83, %82 : vector<2x16xf32>
      %85 = arith.divf %83, %84 : vector<2x16xf32>
      %86 = vector.extract_strided_slice %73 {offsets = [0, 32], sizes = [2, 16], strides = [1, 1]} : vector<2x64xf32> to vector<2x16xf32>
      %87 = math.tanh %86 : vector<2x16xf32>
      %88 = vector.extract_strided_slice %73 {offsets = [0, 48], sizes = [2, 16], strides = [1, 1]} : vector<2x64xf32> to vector<2x16xf32>
      %89 = arith.negf %88 : vector<2x16xf32>
      %90 = math.exp %89 : vector<2x16xf32>
      %cst_53 = arith.constant 1.000000e+00 : f32
      %91 = vector.broadcast %cst_53 : f32 to vector<2x16xf32>
      %92 = arith.addf %91, %90 : vector<2x16xf32>
      %93 = arith.divf %91, %92 : vector<2x16xf32>
      %94 = arith.mulf %85, %arg21 : vector<2x16xf32>
      %95 = arith.mulf %79, %87 : vector<2x16xf32>
      %96 = arith.addf %94, %95 : vector<2x16xf32>
      %97 = math.tanh %96 : vector<2x16xf32>
      %98 = arith.mulf %93, %97 : vector<2x16xf32>
      %c2_i32_54 = arith.constant 2 : i32
      %99 = arith.muli %65, %c2_i32_54 : i32
      %100 = arith.index_cast %99 : i32 to index
      %c0_55 = arith.constant 0 : index
      %101 = vector.load %arg18[%100, %c0_55] : memref<16x16xf32, #tpu.memory_space<vmem>>, vector<2x16xf32>
      tpu.vector_store %arg18[%100, %c0_55], %98 {strides = array<i32>} : memref<16x16xf32, #tpu.memory_space<vmem>>, vector<2x16xf32>,
      scf.yield %98, %96 : vector<2x16xf32>, vector<2x16xf32>
    }
    %c8_i32_19 = arith.constant 8 : i32
    %c0_20 = arith.constant 0 : index
    %c0_21 = arith.constant 0 : index
    %22 = vector.load %arg17[%c0_20, %c0_21] : memref<16x16xf32, #tpu.memory_space<vmem>>, vector<16x16xf32>
    %c0_22 = arith.constant 0 : index
    %c0_23 = arith.constant 0 : index
    %23 = vector.load %arg10[%c0_22, %c0_23] : memref<32x32xf32, #tpu.memory_space<vmem>>, vector<16x32xf32>
    %24 = arith.truncf %22 : vector<16x16xf32> to vector<16x16xbf16>
    %25 = arith.truncf %23 : vector<16x32xf32> to vector<16x32xbf16>
    %cst_24 = arith.constant dense<0.000000e+00> : vector<16x32xf32>
    %26 = tpu.matmul %24, %25, %cst_24 {dimension_numbers = #tpu.dot_dimension_numbers<[1], [0], [0], [1], [0, 0, 1, 1], [], []>} : vector<16x16xbf16>, vector<16x32xbf16>, vector<16x32xf32> -> vector<16x32xf32>
    %c0_25 = arith.constant 0 : index
    %c0_26 = arith.constant 0 : index
    %27 = vector.load %arg18[%c0_25, %c0_26] : memref<16x16xf32, #tpu.memory_space<vmem>>, vector<16x16xf32>
    %c16 = arith.constant 16 : index
    %c0_27 = arith.constant 0 : index
    %28 = vector.load %arg10[%c16, %c0_27] : memref<32x32xf32, #tpu.memory_space<vmem>>, vector<16x32xf32>
    %29 = arith.truncf %27 : vector<16x16xf32> to vector<16x16xbf16>
    %30 = arith.truncf %28 : vector<16x32xf32> to vector<16x32xbf16>
    %cst_28 = arith.constant dense<0.000000e+00> : vector<16x32xf32>
    %31 = tpu.matmul %29, %30, %cst_28 {dimension_numbers = #tpu.dot_dimension_numbers<[1], [0], [0], [1], [0, 0, 1, 1], [], []>} : vector<16x16xbf16>, vector<16x32xbf16>, vector<16x32xf32> -> vector<16x32xf32>
    %32 = arith.addf %26, %31 : vector<16x32xf32>
    %c0_29 = arith.constant 0 : index
    %c0_30 = arith.constant 0 : index
    %33 = vector.load %arg11[%c0_29, %c0_30] : memref<1x32xf32, #tpu.memory_space<vmem>>, vector<1x32xf32>
    %34 = vector.broadcast %33 : vector<1x32xf32> to vector<16x32xf32>
    %35 = arith.addf %32, %34 : vector<16x32xf32>
    %c0_31 = arith.constant 0 : index
    %c0_32 = arith.constant 0 : index
    %36 = vector.load %arg8[%c0_31, %c0_32] : memref<16x32xf32, #tpu.memory_space<vmem>>, vector<16x32xf32>
    %37 = arith.addf %35, %36 : vector<16x32xf32>
    %c0_33 = arith.constant 0 : index
    %c0_34 = arith.constant 0 : index
    %38 = vector.load %arg12[%c0_33, %c0_34] : memref<1x32xf32, #tpu.memory_space<vmem>>, vector<1x32xf32>
    %c0_35 = arith.constant 0 : index
    %c0_36 = arith.constant 0 : index
    %39 = vector.load %arg13[%c0_35, %c0_36] : memref<1x32xf32, #tpu.memory_space<vmem>>, vector<1x32xf32>
    %cst_37 = arith.constant dense<0.000000e+00> : vector<16xf32>
    %40 = vector.multi_reduction <add>, %37, %cst_37 [1] : vector<16x32xf32> to vector<16xf32>
    %41 = vector.shape_cast %40 : vector<16xf32> to vector<16x1xf32>
    %cst_38 = arith.constant 3.200000e+01 : f32
    %42 = vector.broadcast %cst_38 : f32 to vector<16x1xf32>
    %43 = arith.divf %41, %42 : vector<16x1xf32>
    %44 = vector.broadcast %43 : vector<16x1xf32> to vector<16x32xf32>
    %45 = arith.subf %37, %44 : vector<16x32xf32>
    %46 = arith.mulf %45, %45 : vector<16x32xf32>
    %cst_39 = arith.constant dense<0.000000e+00> : vector<16xf32>
    %47 = vector.multi_reduction <add>, %46, %cst_39 [1] : vector<16x32xf32> to vector<16xf32>
    %48 = vector.shape_cast %47 : vector<16xf32> to vector<16x1xf32>
    %cst_40 = arith.constant 3.200000e+01 : f32
    %49 = vector.broadcast %cst_40 : f32 to vector<16x1xf32>
    %50 = arith.divf %48, %49 : vector<16x1xf32>
    %51 = vector.broadcast %43 : vector<16x1xf32> to vector<16x32xf32>
    %52 = arith.subf %37, %51 : vector<16x32xf32>
    %cst_41 = arith.constant 9.99999974E-6 : f32
    %53 = vector.broadcast %cst_41 : f32 to vector<16x1xf32>
    %54 = arith.addf %50, %53 : vector<16x1xf32>
    %55 = math.rsqrt %54 : vector<16x1xf32>
    %56 = vector.broadcast %55 : vector<16x1xf32> to vector<16x32xf32>
    %57 = arith.mulf %52, %56 : vector<16x32xf32>
    %58 = vector.broadcast %38 : vector<1x32xf32> to vector<16x32xf32>
    %59 = arith.mulf %57, %58 : vector<16x32xf32>
    %60 = vector.broadcast %39 : vector<1x32xf32> to vector<16x32xf32>
    %61 = arith.addf %59, %60 : vector<16x32xf32>
    %c0_42 = arith.constant 0 : index
    %c0_43 = arith.constant 0 : index
    %62 = vector.load %arg9[%c0_42, %c0_43] : memref<2x16xf32, #tpu.memory_space<vmem>>, vector<2x16xf32>
    %cst_44 = arith.constant dense<0.000000e+00> : vector<2x32xf32>
    %63 = tpu.matmul %62, %61, %cst_44 {dimension_numbers = #tpu.dot_dimension_numbers<[1], [0], [0], [1], [0, 0, 1, 1], [], []>} : vector<2x16xf32>, vector<16x32xf32>, vector<2x32xf32> -> vector<2x32xf32>
    %c0_45 = arith.constant 0 : index
    %c0_46 = arith.constant 0 : index
    %64 = vector.load %arg14[%c0_45, %c0_46] : memref<2x32xf32, #tpu.memory_space<vmem>>, vector<2x32xf32>
    tpu.vector_store %arg14[%c0_45, %c0_46], %63 {strides = array<i32>} : memref<2x32xf32, #tpu.memory_space<vmem>>, vector<2x32xf32>,
    return
  }
  func.func @transform_0(%arg0: i32) -> (i32, i32) {
    %c0_i32 = arith.constant 0 : i32
    %c0_i32_0 = arith.constant 0 : i32
    %c0_i32_1 = arith.constant 0 : i32
    return %c0_i32, %c0_i32_0 : i32, i32
  }
  func.func @transform_1(%arg0: i32) -> (i32, i32) {
    %c0_i32 = arith.constant 0 : i32
    %c0_i32_0 = arith.constant 0 : i32
    %c0_i32_1 = arith.constant 0 : i32
    return %c0_i32, %c0_i32_0 : i32, i32
  }
  func.func @transform_2(%arg0: i32) -> (i32, i32) {
    %c0_i32 = arith.constant 0 : i32
    %c0_i32_0 = arith.constant 0 : i32
    %c0_i32_1 = arith.constant 0 : i32
    return %c0_i32, %c0_i32_0 : i32, i32
  }
  func.func @transform_3(%arg0: i32) -> (i32, i32) {
    %c0_i32 = arith.constant 0 : i32
    %c0_i32_0 = arith.constant 0 : i32
    %c0_i32_1 = arith.constant 0 : i32
    return %c0_i32, %c0_i32_0 : i32, i32
  }
  func.func @transform_4(%arg0: i32) -> (i32, i32) {
    %c0_i32 = arith.constant 0 : i32
    %c0_i32_0 = arith.constant 0 : i32
    %c0_i32_1 = arith.constant 0 : i32
    return %c0_i32, %c0_i32_0 : i32, i32
  }
  func.func @transform_5(%arg0: i32) -> (i32, i32) {
    %c0_i32 = arith.constant 0 : i32
    %c0_i32_0 = arith.constant 0 : i32
    %c0_i32_1 = arith.constant 0 : i32
    return %c0_i32, %c0_i32_0 : i32, i32
  }
  func.func @transform_6(%arg0: i32) -> (i32, i32) {
    %c0_i32 = arith.constant 0 : i32
    %c0_i32_0 = arith.constant 0 : i32
    %c0_i32_1 = arith.constant 0 : i32
    return %c0_i32, %c0_i32_0 : i32, i32
  }
  func.func @transform_7(%arg0: i32) -> (i32, i32) {
    %c0_i32 = arith.constant 0 : i32
    %c0_i32_0 = arith.constant 0 : i32
    %c0_i32_1 = arith.constant 0 : i32
    return %c0_i32, %c0_i32_0 : i32, i32
  }
  func.func @transform_8(%arg0: i32) -> (i32, i32) {
    %c0_i32 = arith.constant 0 : i32
    %c0_i32_0 = arith.constant 0 : i32
    %c0_i32_1 = arith.constant 0 : i32
    return %c0_i32, %c0_i32_0 : i32, i32
  }
  func.func @transform_9(%arg0: i32) -> (i32, i32) {
    %c0_i32 = arith.constant 0 : i32
    %c0_i32_0 = arith.constant 0 : i32
    %c0_i32_1 = arith.constant 0 : i32
    return %c0_i32, %c0_i32_0 : i32, i32
  }
  func.func @transform_10(%arg0: i32) -> (i32, i32) {
    %c0_i32 = arith.constant 0 : i32
    %c0_i32_0 = arith.constant 0 : i32
    %c0_i32_1 = arith.constant 0 : i32
    return %c0_i32, %c0_i32_0 : i32, i32
  }
  func.func @transform_11(%arg0: i32) -> (i32, i32) {
    %c0_i32 = arith.constant 0 : i32
    %c0_i32_0 = arith.constant 0 : i32
    %c0_i32_1 = arith.constant 0 : i32
    return %c0_i32, %c0_i32_0 : i32, i32
  }
  func.func @transform_12(%arg0: i32) -> (i32, i32) {
    %c0_i32 = arith.constant 0 : i32
    %c0_i32_0 = arith.constant 0 : i32
    %c0_i32_1 = arith.constant 0 : i32
    return %c0_i32, %c0_i32_0 : i32, i32
  }
  func.func @transform_13(%arg0: i32) -> (i32, i32) {
    %c0_i32 = arith.constant 0 : i32
    %c0_i32_0 = arith.constant 0 : i32
    %c0_i32_1 = arith.constant 0 : i32
    return %c0_i32, %c0_i32_0 : i32, i32
  }
}

module attributes {stable_mosaic.version = 11 : i64} {
  func.func @_compressor_kernel(%arg0: memref<2x32xf32, #tpu.memory_space<vmem>>, %arg1: memref<2x32xf32, #tpu.memory_space<vmem>>, %arg2: memref<2x32xf32, #tpu.memory_space<vmem>>, %arg3: memref<96x32xf32, #tpu.memory_space<vmem>>, %arg4: memref<1x32xf32, #tpu.memory_space<vmem>>, %arg5: memref<1x32xf32, #tpu.memory_space<vmem>>, %arg6: memref<1x32xf32, #tpu.memory_space<vmem>>, %arg7: memref<32x16xf32, #tpu.memory_space<vmem>>, %arg8: memref<1x16xf32, #tpu.memory_space<vmem>>, %arg9: memref<2x16xf32, #tpu.memory_space<vmem>>) attributes {dimension_semantics = [], scalar_prefetch = 0 : i64, scratch_operands = 0 : i64, tpu.core_type = #tpu.core_type<tc>} {
    %c0 = arith.constant 0 : index
    %c0_0 = arith.constant 0 : index
    %0 = vector.load %arg0[%c0, %c0_0] : memref<2x32xf32, #tpu.memory_space<vmem>>, vector<2x32xf32>
    %c0_1 = arith.constant 0 : index
    %c0_2 = arith.constant 0 : index
    %1 = vector.load %arg3[%c0_1, %c0_2] : memref<96x32xf32, #tpu.memory_space<vmem>>, vector<32x32xf32>
    %2 = arith.truncf %0 : vector<2x32xf32> to vector<2x32xbf16>
    %3 = arith.truncf %1 : vector<32x32xf32> to vector<32x32xbf16>
    %cst = arith.constant dense<0.000000e+00> : vector<2x32xf32>
    %4 = tpu.matmul %2, %3, %cst {dimension_numbers = #tpu.dot_dimension_numbers<[1], [0], [0], [1], [0, 0, 1, 1], [], []>} : vector<2x32xbf16>, vector<32x32xbf16>, vector<2x32xf32> -> vector<2x32xf32>
    %c0_3 = arith.constant 0 : index
    %c0_4 = arith.constant 0 : index
    %5 = vector.load %arg1[%c0_3, %c0_4] : memref<2x32xf32, #tpu.memory_space<vmem>>, vector<2x32xf32>
    %c32 = arith.constant 32 : index
    %c0_5 = arith.constant 0 : index
    %6 = vector.load %arg3[%c32, %c0_5] : memref<96x32xf32, #tpu.memory_space<vmem>>, vector<32x32xf32>
    %7 = arith.truncf %5 : vector<2x32xf32> to vector<2x32xbf16>
    %8 = arith.truncf %6 : vector<32x32xf32> to vector<32x32xbf16>
    %cst_6 = arith.constant dense<0.000000e+00> : vector<2x32xf32>
    %9 = tpu.matmul %7, %8, %cst_6 {dimension_numbers = #tpu.dot_dimension_numbers<[1], [0], [0], [1], [0, 0, 1, 1], [], []>} : vector<2x32xbf16>, vector<32x32xbf16>, vector<2x32xf32> -> vector<2x32xf32>
    %10 = arith.addf %4, %9 : vector<2x32xf32>
    %c0_7 = arith.constant 0 : index
    %c0_8 = arith.constant 0 : index
    %11 = vector.load %arg2[%c0_7, %c0_8] : memref<2x32xf32, #tpu.memory_space<vmem>>, vector<2x32xf32>
    %c64 = arith.constant 64 : index
    %c0_9 = arith.constant 0 : index
    %12 = vector.load %arg3[%c64, %c0_9] : memref<96x32xf32, #tpu.memory_space<vmem>>, vector<32x32xf32>
    %13 = arith.truncf %11 : vector<2x32xf32> to vector<2x32xbf16>
    %14 = arith.truncf %12 : vector<32x32xf32> to vector<32x32xbf16>
    %cst_10 = arith.constant dense<0.000000e+00> : vector<2x32xf32>
    %15 = tpu.matmul %13, %14, %cst_10 {dimension_numbers = #tpu.dot_dimension_numbers<[1], [0], [0], [1], [0, 0, 1, 1], [], []>} : vector<2x32xbf16>, vector<32x32xbf16>, vector<2x32xf32> -> vector<2x32xf32>
    %16 = arith.addf %10, %15 : vector<2x32xf32>
    %c0_11 = arith.constant 0 : index
    %c0_12 = arith.constant 0 : index
    %17 = vector.load %arg4[%c0_11, %c0_12] : memref<1x32xf32, #tpu.memory_space<vmem>>, vector<1x32xf32>
    %18 = vector.broadcast %17 : vector<1x32xf32> to vector<2x32xf32>
    %19 = arith.addf %16, %18 : vector<2x32xf32>
    %c0_13 = arith.constant 0 : index
    %c0_14 = arith.constant 0 : index
    %20 = vector.load %arg5[%c0_13, %c0_14] : memref<1x32xf32, #tpu.memory_space<vmem>>, vector<1x32xf32>
    %c0_15 = arith.constant 0 : index
    %c0_16 = arith.constant 0 : index
    %21 = vector.load %arg6[%c0_15, %c0_16] : memref<1x32xf32, #tpu.memory_space<vmem>>, vector<1x32xf32>
    %cst_17 = arith.constant dense<0.000000e+00> : vector<2xf32>
    %22 = vector.multi_reduction <add>, %19, %cst_17 [1] : vector<2x32xf32> to vector<2xf32>
    %23 = vector.shape_cast %22 : vector<2xf32> to vector<2x1xf32>
    %cst_18 = arith.constant 3.200000e+01 : f32
    %24 = vector.broadcast %cst_18 : f32 to vector<2x1xf32>
    %25 = arith.divf %23, %24 : vector<2x1xf32>
    %26 = vector.broadcast %25 : vector<2x1xf32> to vector<2x32xf32>
    %27 = arith.subf %19, %26 : vector<2x32xf32>
    %28 = arith.mulf %27, %27 : vector<2x32xf32>
    %cst_19 = arith.constant dense<0.000000e+00> : vector<2xf32>
    %29 = vector.multi_reduction <add>, %28, %cst_19 [1] : vector<2x32xf32> to vector<2xf32>
    %30 = vector.shape_cast %29 : vector<2xf32> to vector<2x1xf32>
    %cst_20 = arith.constant 3.200000e+01 : f32
    %31 = vector.broadcast %cst_20 : f32 to vector<2x1xf32>
    %32 = arith.divf %30, %31 : vector<2x1xf32>
    %33 = vector.broadcast %25 : vector<2x1xf32> to vector<2x32xf32>
    %34 = arith.subf %19, %33 : vector<2x32xf32>
    %cst_21 = arith.constant 9.99999974E-6 : f32
    %35 = vector.broadcast %cst_21 : f32 to vector<2x1xf32>
    %36 = arith.addf %32, %35 : vector<2x1xf32>
    %37 = math.rsqrt %36 : vector<2x1xf32>
    %38 = vector.broadcast %37 : vector<2x1xf32> to vector<2x32xf32>
    %39 = arith.mulf %34, %38 : vector<2x32xf32>
    %40 = vector.broadcast %20 : vector<1x32xf32> to vector<2x32xf32>
    %41 = arith.mulf %39, %40 : vector<2x32xf32>
    %42 = vector.broadcast %21 : vector<1x32xf32> to vector<2x32xf32>
    %43 = arith.addf %41, %42 : vector<2x32xf32>
    %cst_22 = arith.constant 0.000000e+00 : f32
    %44 = vector.broadcast %cst_22 : f32 to vector<2x32xf32>
    %45 = arith.cmpf oge, %43, %44 : vector<2x32xf32>
    %cst_23 = arith.constant 0.00999999977 : f32
    %46 = vector.broadcast %cst_23 : f32 to vector<2x32xf32>
    %47 = arith.mulf %46, %43 : vector<2x32xf32>
    %48 = arith.select %45, %43, %47 : vector<2x32xi1>, vector<2x32xf32>
    %c0_24 = arith.constant 0 : index
    %c0_25 = arith.constant 0 : index
    %49 = vector.load %arg7[%c0_24, %c0_25] : memref<32x16xf32, #tpu.memory_space<vmem>>, vector<32x16xf32>
    %50 = arith.truncf %48 : vector<2x32xf32> to vector<2x32xbf16>
    %51 = arith.truncf %49 : vector<32x16xf32> to vector<32x16xbf16>
    %cst_26 = arith.constant dense<0.000000e+00> : vector<2x16xf32>
    %52 = tpu.matmul %50, %51, %cst_26 {dimension_numbers = #tpu.dot_dimension_numbers<[1], [0], [0], [1], [0, 0, 1, 1], [], []>} : vector<2x32xbf16>, vector<32x16xbf16>, vector<2x16xf32> -> vector<2x16xf32>
    %c0_27 = arith.constant 0 : index
    %c0_28 = arith.constant 0 : index
    %53 = vector.load %arg8[%c0_27, %c0_28] : memref<1x16xf32, #tpu.memory_space<vmem>>, vector<1x16xf32>
    %54 = vector.broadcast %53 : vector<1x16xf32> to vector<2x16xf32>
    %55 = arith.addf %52, %54 : vector<2x16xf32>
    %c0_29 = arith.constant 0 : index
    %c0_30 = arith.constant 0 : index
    %56 = vector.load %arg9[%c0_29, %c0_30] : memref<2x16xf32, #tpu.memory_space<vmem>>, vector<2x16xf32>
    tpu.vector_store %arg9[%c0_29, %c0_30], %55 {strides = array<i32>} : memref<2x16xf32, #tpu.memory_space<vmem>>, vector<2x16xf32>,
    return
  }
}

</mosaic_0001>

<bundles_post_ra>
// kernel: siamprom_forward.5
= control target key start
LH: loop header
LB: loop body
LE: loop exit
PB: predicated region body
PF: predicated region fallthrough
CT: control target
= control target key end

     0   :  { %s343_s12 = smov 0   ;;  %s375_s0 = inlined_call_operand.vmem [shape: f32[2,8,32], index: 0, kind: input, shape index: {}]   ;;  %s376_s1 = inlined_call_operand.vmem [shape: f32[32,96], index: 1, kind: input, shape index: {}]   ;;  %s377_s2 = inlined_call_operand.vmem [shape: f32[1,96], index: 2, kind: input, shape index: {}]   ;;  %s378_s3 = inlined_call_operand.vmem [shape: f32[2,8,96], index: 3, kind: output, shape index: {}]  }
   0x1 LB: > { %s281_s13 = sadd.s32 4294967295, %s319_s12   ;;  %p285_p0 = scmp.ge.s32.totalorder %s319_s12, 1  ;;  %s319_s12 = sphi %s343_s12, %s13_s12  }
   0x2   : > { %p136_p1 = scmp.lt.s32.totalorder %s319_s12, 3 }
   0x4   : > { %p137_p2 = pnand %p285_p0, %p136_p1 }
   0x5   : > { %p158_p3 = scmp.lt.s32.totalorder (!%p137_p2), %s281_s13, 1 }
   0x6   : > { %140 = sbr.rel (%p137_p2) target bundleno = 220 (0xdc), region = 32 }
   0xb   : > { %v170_v0 = vld [vmem:[%s376_s1 + $0x10] sm:$0xff]  ;;  %v171_v1 = vld [vmem:[%s376_s1 + $0x18] sm:$0xff]  ;;  %v168_v2 = vld [vmem:[%s376_s1] sm:$0xff]  ;;  %v321_v3 = vmov 0.0   ;;  %vm322_vm0 = vmmov 0   ;;  %s380_s13 = smov (!%p158_p3, %s281_s13), 1 }
   0xc   : > { %295 = vmatprep.subr.bf16.mxu0 %v321_v3  ;;  %v174_v4 = vpack.c.bf16 %v171_v1, %v170_v0  ;;  %v169_v5 = vld [vmem:[%s376_s1 + $0x8] sm:$0xff]  ;;  %299 = vmatprep.mubr.msk.bf16.mxu0 %vm322_vm0, %v321_v3  ;;  %s286_s22 = sshll.u32 %s380_s13, 3  ;;  %vm182_vm1 = vcmask 261120   ;;  %v288_v9 = vld [vmem:[%s377_s2] ss:$0 sm:$0xff]  ;;  %vm226_vm2 = vcmask 785408  }
   0xd   : > { %v173_v6 = vpack.c.bf16 %v169_v5, %v168_v2  ;;  %s161_s25 = scalar_lea.vmem %s375_s0, %s286_s22  ;;  %s165_s30 = scalar_lea.vmem %s378_s3, %s286_s22 }
   0xe   : > { %296 = vmatpush3.bf16.msra.mxu0 %v174_v4  ;;  %v167_v7 = vld [vmem:[%s161_s25] sm:$0xff] }
   0xf   : > { %297 = vmatprep.subr.bf16.mxu0 %v321_v3  ;;  %v172_v8 = vpack.c.bf16 %v167_v7, %v167_v7 }
  0x12   : > { %298 = vmatpush3.bf16.msra.mxu0 %v173_v6 }
  0x15   : > { %300 = vmatmul.mubr.msk.bf16.vlgmr.msra.gmra.mxu0 %vm182_vm1, %v172_v8 }
  0xd5   : > { %v220_v10 = vpop.f32.mrf.mxu0 }
  0xd6   : > { %v221_v11 = vadd.f32 %v288_v9, %v220_v10 }
  0xd7   : > { %v301_v12 = vpop.f32.mrf.mxu0 }
  0xd8   : > { %227 = vst.msk [vmem:[%s165_s30] sm:$0xff] %vm226_vm2, %v221_v11 }
  0xd9   : > { %v223_v13 = vpop.f32.mrf.mxu0 }
  0xdb   : > { %v302_v14 = vpop.f32.mrf.mxu0 }
  0xdc PF: > { %s13_s12 = sadd.s32 1, %s319_s12  }
  0xdd   : > { %p10_p4 = scmp.ge.s32.totalorder %s13_s12, 4  }
  0xdf   :  { %12 = sbr.rel (!%p10_p4) target bundleno = 1 (0x1), region = 62 }

// kernel: siamprom_forward.7
= control target key start
LH: loop header
LB: loop body
LE: loop exit
PB: predicated region body
PF: predicated region fallthrough
CT: control target
= control target key end

     0   :  { %s627_s18 = smov 0   ;;  %s727_s0 = inlined_call_operand.vmem [shape: f32[2,10,32], index: 0, kind: input, shape index: {}]   ;;  %s728_s1 = inlined_call_operand.vmem [shape: f32[96,64], index: 1, kind: input, shape index: {}]   ;;  %s729_s2 = inlined_call_operand.vmem [shape: f32[1,64], index: 2, kind: input, shape index: {}]   ;;  %s730_s3 = inlined_call_operand.vmem [shape: f32[64,32], index: 3, kind: input, shape index: {}]   ;;  %s731_s4 = inlined_call_operand.vmem [shape: f32[1,32], index: 4, kind: input, shape index: {}]   ;;  %s732_s5 = inlined_call_operand.vmem [shape: f32[2,1,32], index: 5, kind: output, shape index: {}]  }
   0x1 LB: > { %s511_s19 = sadd.s32 4294967295, %s593_s18   ;;  %p515_p0 = scmp.ge.s32.totalorder %s593_s18, 1  ;;  %s593_s18 = sphi %s627_s18, %s15_s18  }
   0x2   : > { %p187_p1 = scmp.lt.s32.totalorder %s593_s18, 3 }
   0x4   : > { %p188_p2 = pnand %p515_p0, %p187_p1 }
   0x5   : > { %p213_p3 = scmp.lt.s32.totalorder (!%p188_p2), %s511_s19, 1 }
   0x6   : > { %191 = sbr.rel (%p188_p2) target bundleno = 444 (0x1bc), region = 40 }
   0xb   : > { %v234_v0 = vld [vmem:[%s728_s1 + $0x30] sm:$0xff]  ;;  %v235_v1 = vld [vmem:[%s728_s1 + $0x38] sm:$0xff]  ;;  %v595_v3 = vmov 0.0   ;;  %v232_v6 = vld [vmem:[%s728_s1 + $0x20] sm:$0xff]  ;;  %vm596_vm0 = vmmov 0   ;;  %s734_s19 = smov (!%p213_p3, %s511_s19), 1 }
   0xc   : > { %v227_v2 = vld [vmem:[%s728_s1 + $0x10] sm:$0xff]  ;;  %541 = vmatprep.subr.bf16.mxu0 %v595_v3  ;;  %v238_v4 = vpack.c.bf16 %v235_v1, %v234_v0  ;;  %549 = vmatprep.subr.bf16.mxu1 %v595_v3  ;;  %v228_v5 = vld [vmem:[%s728_s1 + $0x18] sm:$0xff]  ;;  %v233_v7 = vld [vmem:[%s728_s1 + $0x28] sm:$0xff]  ;;  %s526_s11 = sshll.u32 %s734_s19, 4  ;;  %vm239_vm1 = vcmask 261120   ;;  %vm408_vm3 = vcmask 523264   ;;  %s220_s24 = scalar_lea.vmem %s732_s5, %s734_s19 }
   0xd   : > { %v231_v8 = vpack.c.bf16 %v228_v5, %v227_v2  ;;  %v225_v9 = vld [vmem:[%s728_s1] sm:$0xff]  ;;  %v226_v10 = vld [vmem:[%s728_s1 + $0x8] sm:$0xff]  ;;  %545 = vmatprep.mubr.msk.bf16.mxu0 %vm596_vm0, %v595_v3  ;;  %553 = vmatprep.mubr.msk.bf16.mxu1 %vm596_vm0, %v595_v3  ;;  %v237_v11 = vpack.c.bf16 %v233_v7, %v232_v6  ;;  %v328_v13 = vld [vmem:[%s728_s1 + $0x50] sm:$0xff]  ;;  %s217_s20 = scalar_lea.vmem %s727_s0, %s526_s11  ;;  %vm462_vm4 = vcmask 253952  }
   0xe   : > { %542 = vmatpush3.bf16.msra.mxu0 %v238_v4  ;;  %v230_v12 = vpack.c.bf16 %v226_v10, %v225_v9  ;;  %v329_v14 = vld [vmem:[%s728_s1 + $0x58] sm:$0xff]  ;;  %v673_v15 = vld [vmem:[%s217_s20 + $0x1] sm:$0xff]  ;;  %v394_v25 = vld [vmem:[%s730_s3 + $0x30] sm:$0xff] }
   0xf   : > { %550 = vmatpush3.bf16.msra.mxu1 %v231_v8  ;;  %543 = vmatprep.subr.bf16.mxu0 %v595_v3  ;;  %v222_v16 = vld [vmem:[%s217_s20] sm:$0xff]  ;;  %v236_v17 = vpack.c.bf16 %v673_v15, %v673_v15  ;;  %v332_v19 = vpack.c.bf16 %v329_v14, %v328_v13  ;;  %v327_v21 = vld [vmem:[%s728_s1 + $0x48] sm:$0xff]  ;;  %v395_v26 = vld [vmem:[%s730_s3 + $0x38] sm:$0xff] }
  0x10   : > { %551 = vmatprep.subr.bf16.mxu1 %v595_v3  ;;  %v229_v18 = vpack.c.bf16 %v222_v16, %v222_v16  ;;  %v326_v20 = vld [vmem:[%s728_s1 + $0x40] sm:$0xff]  ;;  %v400_v27 = vpack.c.bf16 %v395_v26, %v394_v25  ;;  %v393_v29 = vld [vmem:[%s730_s3 + $0x28] sm:$0xff]  ;;  %v390_v31 = vld [vmem:[%s730_s3 + $0x10] sm:$0xff] }
  0x11   : > { %v331_v22 = vpack.c.bf16 %v327_v21, %v326_v20  ;;  %v224_v23 = vld [vmem:[%s217_s20 + $0x2] sm:$0xff]  ;;  %v391_v32 = vld [vmem:[%s730_s3 + $0x18] sm:$0xff]  ;;  %v521_v47 = vld [vmem:[%s729_s2] ss:$0 sm:$0xff] }
  0x12   : > { %544 = vmatpush3.bf16.msra.mxu0 %v237_v11  ;;  %v330_v24 = vpack.c.bf16 %v224_v23, %v224_v23  ;;  %v392_v28 = vld [vmem:[%s730_s3 + $0x20] sm:$0xff]  ;;  %v398_v33 = vpack.c.bf16 %v391_v32, %v390_v31  ;;  %v389_v35 = vld [vmem:[%s730_s3 + $0x8] sm:$0xff] }
  0x13   : > { %552 = vmatpush3.bf16.msra.mxu1 %v230_v12  ;;  %557 = vmatprep.subr.bf16.mxu0 %v595_v3  ;;  %v399_v30 = vpack.c.bf16 %v393_v29, %v392_v28  ;;  %v388_v34 = vld [vmem:[%s730_s3] sm:$0xff] }
  0x14   : > { %565 = vmatprep.subr.bf16.mxu1 %v595_v3  ;;  %v397_v36 = vpack.c.bf16 %v389_v35, %v388_v34  ;;  %v522_v56 = vld [vmem:[%s731_s4] ss:$0 sm:$0xff] }
  0x15   : > { %546 = vmatmul.mubr.msk.bf16.vlgmr.msra.gmra.mxu0 %vm239_vm1, %v236_v17 }
  0x16   : > { %554 = vmatmul.mubr.msk.bf16.vlgmr.msra.gmra.mxu1 %vm239_vm1, %v229_v18  ;;  %558 = vmatpush3.bf16.msra.mxu0 %v332_v19 }
  0x17   : > { %559 = vmatprep.subr.bf16.mxu0 %v595_v3  ;;  %561 = vmatprep.mubr.msk.bf16.mxu0 %vm596_vm0, %v595_v3 }
  0x18   : > { %573 = vmatprep.mubr.msk.bf16.mxu1 %vm596_vm0, %v595_v3  ;;  %566 = vmatpush3.bf16.msra.mxu1 %v400_v27 }
  0x19   : > { %567 = vmatprep.subr.bf16.mxu1 %v595_v3 }
  0x1a   : > { %560 = vmatpush3.bf16.msra.mxu0 %v331_v22 }
  0x1c   : > { %568 = vmatpush3.bf16.msra.mxu1 %v399_v30 }
  0x1d   : > { %562 = vmatmul.mubr.msk.bf16.vlgmr.msra.gmra.mxu0 %vm239_vm1, %v330_v24  ;;  %569 = vmatprep.subr.bf16.mxu1 %v595_v3 }
  0x20   : > { %570 = vmatpush3.bf16.msra.mxu1 %v398_v33 }
  0x21   : > { %571 = vmatprep.subr.bf16.mxu1 %v595_v3 }
  0x24   : > { %572 = vmatpush3.bf16.msra.mxu1 %v397_v36 }
  0xd5   : > { %v277_v37 = vpop.f32.mrf.mxu0 }
  0xd6   : > { %v320_v38 = vpop.f32.mrf.mxu1 }
  0xd7   : > { %v547_v39 = vpop.f32.mrf.mxu0  ;;  %v321_v44 = vadd.f32 %v320_v38, %v277_v37 }
  0xd8   : > { %v555_v40 = vpop.f32.mrf.mxu1 }
  0xd9   : > { %v280_v41 = vpop.f32.mrf.mxu0 }
  0xda   : > { %v323_v42 = vpop.f32.mrf.mxu1 }
  0xdb   : > { %v548_v43 = vpop.f32.mrf.mxu0 }
  0xdc   : > { %v556_v45 = vpop.f32.mrf.mxu1 }
  0xdd   : > { %v370_v46 = vpop.f32.mrf.mxu0 }
  0xde   : > { %v376_v48 = vadd.f32 %v370_v46, %v321_v44 }
  0xdf   : > { %v563_v49 = vpop.f32.mrf.mxu0 }
  0xe0   : > { %v384_v50 = vadd.f32 %v521_v47, %v376_v48 }
  0xe1   : > { %v373_v51 = vpop.f32.mrf.mxu0 }
  0xe2   : > { %vm385_vm2 = vcmp.ge.f32.partialorder %v384_v50, 0.0  ;;  %v386_v52 = vmul.f32 0.01, %v384_v50 }
  0xe3   : > { %v564_v53 = vpop.f32.mrf.mxu0 }
  0xe4   : > { %v387_v54 = vsel %vm385_vm2, %v384_v50, %v386_v52 }
  0xe5   : > { %v396_v55 = vpack.c.bf16 %v387_v54, %v387_v54 }
  0xe7   : > { %574 = vmatmul.mubr.msk.bf16.vlgmr.msra.gmra.mxu1 %vm408_vm3, %v396_v55 }
 0x1a7   : > { %v446_v57 = vpop.f32.mrf.mxu1 }
 0x1a8   : > { %v447_v58 = vadd.f32 %v522_v56, %v446_v57 }
 0x1a9   : > { %v575_v59 = vpop.f32.mrf.mxu1 }
 0x1aa   : > { %v452_v60 = vadd.f32 %v447_v58, %v673_v15 }
 0x1ab   : > { %v449_v61 = vpop.f32.mrf.mxu1 }
 0x1ac   : > { %v453_v62 = vsel %vm239_vm1, %v452_v60, 0.0 }
 0x1ad   : > { %v454_v63 = vrot.slane %v453_v62, 4  ;;  %v576_v0 = vpop.f32.mrf.mxu1 }
 0x1af   : > { %v455_v1 = vadd.f32 %v454_v63, %v453_v62 }
 0x1b1   : > { %v456_v2 = vrot.slane %v455_v1, 2 }
 0x1b3   : > { %v457_v3 = vadd.f32 %v456_v2, %v455_v1 }
 0x1b5   : > { %v458_v4 = vrot.slane %v457_v3, 1 }
 0x1b7   : > { %v459_v5 = vadd.f32 %v458_v4, %v457_v3 }
 0x1b9   : > { %v461_v6 = vmul.f32 0.125, %v459_v5 }
 0x1bb   : > { %463 = vst.msk [vmem:[%s220_s24] sm:$0x1] %vm462_vm4, %v461_v6 }
 0x1bc PF: > { %s15_s18 = sadd.s32 1, %s593_s18  }
 0x1bd   : > { %p12_p4 = scmp.ge.s32.totalorder %s15_s18, 4  }
 0x1bf   :  { %14 = sbr.rel (!%p12_p4) target bundleno = 1 (0x1), region = 70 }

// kernel: siamprom_forward.6
= control target key start
LH: loop header
LB: loop body
LE: loop exit
PB: predicated region body
PF: predicated region fallthrough
CT: control target
= control target key end

     0   :  { %s1437_s30 = smov 0   ;;  %s1604_s0 = inlined_call_operand.vmem [shape: f32[2,4,8,8], index: 0, kind: input, shape index: {}]   ;;  %s1605_s1 = inlined_call_operand.vmem [shape: f32[2,4,8,8], index: 1, kind: input, shape index: {}]   ;;  %s1606_s2 = inlined_call_operand.vmem [shape: f32[2,4,8,8], index: 2, kind: input, shape index: {}]   ;;  %s1607_s3 = inlined_call_operand.vmem [shape: f32[2,1,8], index: 3, kind: input, shape index: {}]   ;;  %s1608_s4 = inlined_call_operand.vmem [shape: f32[2,8,32], index: 4, kind: input, shape index: {}]   ;;  %s1609_s5 = inlined_call_operand.vmem [shape: f32[32,32], index: 5, kind: input, shape index: {}]   ;;  %s1610_s6 = inlined_call_operand.vmem [shape: f32[1,32], index: 6, kind: input, shape index: {}]   ;;  %s1611_s7 = inlined_call_operand.vmem [shape: f32[1,32], index: 7, kind: input, shape index: {}]   ;;  %s1612_s8 = inlined_call_operand.vmem [shape: f32[1,32], index: 8, kind: input, shape index: {}]   ;;  %s1613_s9 = inlined_call_operand.vmem [shape: f32[2,1,32], index: 9, kind: output, shape index: {}]  }
   0x1 LB: > { %s1210_s10 = sadd.s32 4294967295, %s1382_s30   ;;  %p1214_p0 = scmp.ge.s32.totalorder %s1382_s30, 1  ;;  %s1382_s30 = sphi %s1437_s30, %s19_s30  }
   0x2   : > { %p324_p1 = scmp.lt.s32.totalorder %s1382_s30, 3 }
   0x4   : > { %p325_p2 = pnand %p1214_p0, %p324_p1 }
   0x5   : > { %p375_p3 = scmp.lt.s32.totalorder (!%p325_p2), %s1210_s10, 1 }
   0x6   : > { %328 = sbr.rel (%p325_p2) target bundleno = 3002 (0xbba), region = 56 }
   0xb   : > { %v1384_v0 = vmov 0.0   ;;  %vm1385_vm0 = vmmov 0   ;;  %s1615_s10 = smov (!%p375_p3, %s1210_s10), 1  ;;  %vm408_vm1 = vcmask 64512   ;;  %v458_v6 = vlaneseq  ;;  %v642_v56 = vld [vmem:[%s1609_s5 + $0x8] sm:$0xff]  ;;  %v524_v60 = vld [vmem:[%s1609_s5] sm:$0xff] }
   0xc   : > { %1275 = vmatprep.subr.bf16.mxu0 %v1384_v0  ;;  %1277 = vmatprep.mubr.msk.bf16.mxu0 %vm1385_vm0, %v1384_v0  ;;  %s1454_s11 = sshll.u32 %s1615_s10, 5  ;;  %s392_s20 = scalar_lea.vmem %s1607_s3, %s1615_s10  ;;  %v1386_v10 = vmov 0   ;;  %vm480_vm4 = vcmask 1043456   ;;  %v644_v57 = vpack.c.bf16 %v642_v56, %v642_v56  ;;  %v526_v61 = vpack.c.bf16 %v524_v60, %v524_v60 }
   0xd   : > { %1281 = vmatprep.subr.bf16.mxu1 %v1384_v0  ;;  %1283 = vmatprep.mubr.msk.bf16.mxu1 %vm1385_vm0, %v1384_v0  ;;  %s1460_s14 = scalar_lea.vmem %s1605_s1, %s1454_s11  ;;  %s1467_s17 = scalar_lea.vmem %s1604_s0, %s1454_s11  ;;  %v402_v7 = vld [vmem:[%s392_s20] sm:$0x1]  ;;  %v459_v8 = vshrl.u32 %v458_v6, 7  ;;  %vm1078_vm5 = vcmask 261120   ;;  %vm1116_vm6 = vcmask 253952  }
   0xe   : > { %v404_v1 = vld [vmem:[%s1460_s14] sm:$0xff]  ;;  %vm456_vm2 = vcmp.gt.f32.partialorder %v402_v7, 0.5  ;;  %s1490_s23 = scalar_lea.vmem %s1606_s2, %s1454_s11  ;;  %v1225_v29 = vld [vmem:[%s1460_s14 + $0x8] sm:$0xff]  ;;  %v649_v58 = vsel %vm480_vm4, %v644_v57, 0  ;;  %s1221_s13 = sshll.u32 %s1615_s10, 3 }
   0xf   : > { %v407_v2 = vpack.c.bf16 %v404_v1, %v404_v1  ;;  %v403_v4 = vld [vmem:[%s1467_s17] sm:$0xff]  ;;  %v460_v9 = vsub.s32 0, %v459_v8  ;;  %v457_v11 = vsel %vm456_vm2, 1, %v1386_v10  ;;  %v534_v30 = vpack.c.bf16 %v1225_v29, %v1225_v29  ;;  %v1224_v35 = vld [vmem:[%s1467_s17 + $0x8] sm:$0xff]  ;;  %s396_s16 = scalar_lea.vmem %s1608_s4, %s1221_s13  ;;  %s399_s25 = scalar_lea.vmem %s1613_s9, %s1615_s10 }
  0x10   : > { %v406_v5 = vpack.c.bf16 %v403_v4, %v403_v4  ;;  %v405_v25 = vld [vmem:[%s1490_s23] sm:$0xff]  ;;  %v533_v36 = vpack.c.bf16 %v1224_v35, %v1224_v35  ;;  %v1226_v53 = vld [vmem:[%s1490_s23 + $0x8] sm:$0xff]  ;;  %v1232_v4 = vld [vmem:[%s1460_s14 + $0x10] sm:$0xff] }
  0x11   : > { %v413_v3 = vsel %vm408_vm1, %v407_v2, 0  ;;  %v1479_v12 = vrot.slane %v457_v11, %v460_v9  ;;  %v476_v26 = vpack.c.bf16 %v405_v25, %v405_v25  ;;  %v539_v34 = vsel %vm408_vm1, %v534_v30, 0  ;;  %v1231_v11 = vld [vmem:[%s1467_s17 + $0x10] sm:$0xff] }
  0x12   : > { %1276 = vmatpush3.bf16.xpose.msra.mxu0 %v413_v3  ;;  %v595_v54 = vpack.c.bf16 %v1226_v53, %v1226_v53  ;;  %v695_v2 = vsel %vm480_vm4, %v526_v61, 0  ;;  %v1233_v35 = vld [vmem:[%s1490_s23 + $0x10] sm:$0xff] }
  0x13   : > { %1293 = vmatprep.subr.bf16.mxu0 %v1384_v0  ;;  %vm462_vm3 = vcmp.eq.s32.totalorder %v1479_v12, 1  ;;  %v482_v27 = vsel %vm480_vm4, %v476_v26, 0 }
  0x14   : > { %1282 = vmatpush3.bf16.msra.mxu1 %v482_v27  ;;  %v600_v55 = vsel %vm480_vm4, %v595_v54, 0 }
  0x15   : > { %1287 = vmatprep.subr.bf16.mxu1 %v1384_v0 }
  0x19   : > { %1278 = vmatmul.mubr.msk.bf16.vlgmr.msra.gmra.mxu0 %vm408_vm1, %v406_v5  ;;  %v744_v5 = vpack.c.bf16 %v1232_v4, %v1232_v4 }
  0x1a   : > { %1295 = vmatprep.mubr.msk.bf16.mxu0 %vm1385_vm0, %v1384_v0  ;;  %1294 = vmatpush3.bf16.msra.mxu0 %v600_v55 }
  0x1b   : > { %1305 = vmatprep.subr.bf16.mxu0 %v1384_v0  ;;  %v749_v8 = vsel %vm408_vm1, %v744_v5, 0 }
  0xd9   : > { %v449_v13 = vpop.f32.mrf.mxu0 }
  0xda   : > { %v455_v14 = vmul.f32 0.35355338, %v449_v13 }
  0xdb   : > { %v1279_v15 = vpop.f32.mrf.mxu0 }
  0xdc   : > { %v463_v16 = vsel %vm462_vm3, -1e+09, %v455_v14  ;;  %v743_v14 = vpack.c.bf16 %v1231_v11, %v1231_v11 }
  0xdd   : > { %v452_v17 = vpop.f32.mrf.mxu0  ;;  %v464_v18 = vsel %vm408_vm1, %v463_v16, -inf }
  0xde   : > { %465 = vmax.xlane.f32.xlu0 %v464_v18 }
  0xdf   : > { %v1280_v19 = vpop.f32.mrf.mxu0 }
 0x167   : > { %v466_v20 = vpop.xlane.xlu0 %465 }
 0x168   : > { %v467_v21 = vsub.f32 %v463_v16, %v466_v20 }
 0x16a   : > { %v468_v22 = vmul.f32 1.442695, %v467_v21 }
 0x16c   : > { %1358 = vpow2.f32 %v468_v22 }
 0x179   : > { %v1359_v23 = vpop.eup %1358 }
 0x17a   : > { %v470_v24 = vsel %vm408_vm1, %v1359_v23, 0.0 }
 0x17b   : > { %471 = vadd.xlane.f32.xlu0 %v470_v24 }
 0x204   : > { %v472_v28 = vpop.xlane.xlu0 %471 }
 0x205   : > { %1360 = vrcp.f32 %v472_v28 }
 0x212   : > { %v1361_v31 = vpop.eup %1360 }
 0x213   : > { %v474_v32 = vmul.f32 %v1361_v31, %v1359_v23 }
 0x215   : > { %v475_v33 = vpack.c.bf16 %v474_v32, %v474_v32 }
 0x217   : > { %1284 = vmatmul.mubr.msk.bf16.vlgmr.msra.gmra.mxu1 %vm408_vm1, %v475_v33 }
 0x218   : > { %1288 = vmatpush3.bf16.xpose.msra.mxu1 %v539_v34  ;;  %1289 = vmatprep.mubr.msk.bf16.mxu1 %vm1385_vm0, %v1384_v0 }
 0x219   : > { %1299 = vmatprep.subr.bf16.mxu1 %v1384_v0 }
 0x21f   : > { %1290 = vmatmul.mubr.msk.bf16.vlgmr.msra.gmra.mxu1 %vm408_vm1, %v533_v36  ;;  %v805_v36 = vpack.c.bf16 %v1233_v35, %v1233_v35 }
 0x220   : > { %1301 = vmatprep.mubr.msk.bf16.mxu1 %vm1385_vm0, %v1384_v0  ;;  %1300 = vmatpush3.bf16.msra.mxu1 %v649_v58 }
 0x221   : > { %1311 = vmatprep.subr.bf16.mxu1 %v1384_v0 }
 0x2d7   : > { %v518_v37 = vpop.f32.mrf.mxu1 }
 0x2d8   : > { %v525_v3 = vpack.c.bf16 %v518_v37, %v518_v37  ;;  %v810_v37 = vsel %vm480_vm4, %v805_v36, 0 }
 0x2d9   : > { %v1285_v38 = vpop.f32.mrf.mxu1 }
 0x2db   : > { %v521_v39 = vpop.f32.mrf.mxu1 }
 0x2dc   : > { %v1238_v39 = vld [vmem:[%s1460_s14 + $0x18] sm:$0xff] }
 0x2dd   : > { %v1286_v40 = vpop.f32.mrf.mxu1 }
 0x2de   : > { %v909_v40 = vpack.c.bf16 %v1238_v39, %v1238_v39 }
 0x2df   : > { %v575_v41 = vpop.f32.mrf.mxu1 }
 0x2e0   : > { %v581_v42 = vmul.f32 0.35355338, %v575_v41 }
 0x2e1   : > { %v1291_v43 = vpop.f32.mrf.mxu1 }
 0x2e2   : > { %v582_v44 = vsel %vm462_vm3, -1e+09, %v581_v42 }
 0x2e3   : > { %v578_v45 = vpop.f32.mrf.mxu1  ;;  %v583_v46 = vsel %vm408_vm1, %v582_v44, -inf }
 0x2e4   : > { %584 = vmax.xlane.f32.xlu1 %v583_v46  ;;  %v1237_v45 = vld [vmem:[%s1467_s17 + $0x18] sm:$0xff] }
 0x2e5   : > { %v1292_v47 = vpop.f32.mrf.mxu1  ;;  %v908_v46 = vpack.c.bf16 %v1237_v45, %v1237_v45  ;;  %v1245_v45 = vld [vmem:[%s1612_s8] ss:$0 sm:$0xff] }
 0x2e6   : > { %v852_v47 = vld [vmem:[%s1609_s5 + $0x10] sm:$0xff] }
 0x36d   : > { %v585_v48 = vpop.xlane.xlu1 %584 }
 0x36e   : > { %v586_v49 = vsub.f32 %v582_v44, %v585_v48  ;;  %v914_v44 = vsel %vm408_vm1, %v909_v40, 0  ;;  %v854_v48 = vpack.c.bf16 %v852_v47, %v852_v47 }
 0x370   : > { %v587_v50 = vmul.f32 1.442695, %v586_v49  ;;  %v859_v49 = vsel %vm480_vm4, %v854_v48, 0 }
 0x372   : > { %1362 = vpow2.f32 %v587_v50 }
 0x37f   : > { %v1363_v51 = vpop.eup %1362 }
 0x380   : > { %v589_v52 = vsel %vm408_vm1, %v1363_v51, 0.0 }
 0x381   : > { %590 = vadd.xlane.f32.xlu1 %v589_v52 }
 0x40a   : > { %v591_v59 = vpop.xlane.xlu1 %590 }
 0x40b   : > { %1364 = vrcp.f32 %v591_v59 }
 0x418   : > { %v1365_v62 = vpop.eup %1364 }
 0x419   : > { %v593_v63 = vmul.f32 %v1365_v62, %v1363_v51 }
 0x41b   : > { %v594_v1 = vpack.c.bf16 %v593_v63, %v593_v63 }
 0x41d   : > { %1296 = vmatmul.mubr.msk.bf16.vlgmr.msra.gmra.mxu0 %vm408_vm1, %v594_v1 }
 0x41e   : > { %1306 = vmatpush3.bf16.msra.mxu0 %v695_v2  ;;  %1307 = vmatprep.mubr.msk.bf16.mxu0 %vm1385_vm0, %v1384_v0 }
 0x41f   : > { %1317 = vmatprep.subr.bf16.mxu0 %v1384_v0 }
 0x425   : > { %1308 = vmatmul.mubr.msk.bf16.vlgmr.msra.gmra.mxu0 %vm408_vm1, %v525_v3  ;;  %v1239_v3 = vld [vmem:[%s1490_s23 + $0x18] sm:$0xff] }
 0x426   : > { %1319 = vmatprep.mubr.msk.bf16.mxu0 %vm1385_vm0, %v1384_v0  ;;  %1318 = vmatpush3.bf16.msra.mxu0 %v810_v37  ;;  %v970_v4 = vpack.c.bf16 %v1239_v3, %v1239_v3 }
 0x427   : > { %1329 = vmatprep.subr.bf16.mxu0 %v1384_v0 }
 0x428   : > { %v975_v5 = vsel %vm480_vm4, %v970_v4, 0 }
 0x4dd   : > { %v636_v6 = vpop.f32.mrf.mxu0 }
 0x4de   : > { %v643_v7 = vpack.c.bf16 %v636_v6, %v636_v6 }
 0x4df   : > { %v1297_v9 = vpop.f32.mrf.mxu0 }
 0x4e0   : > { %1302 = vmatmul.mubr.msk.bf16.vlgmr.msra.gmra.mxu1 %vm408_vm1, %v643_v7  ;;  %v1017_v9 = vld [vmem:[%s1609_s5 + $0x18] sm:$0xff] }
 0x4e1   : > { %1312 = vmatpush3.bf16.xpose.msra.mxu1 %v749_v8  ;;  %v639_v10 = vpop.f32.mrf.mxu0  ;;  %1313 = vmatprep.mubr.msk.bf16.mxu1 %vm1385_vm0, %v1384_v0  ;;  %v1019_v11 = vpack.c.bf16 %v1017_v9, %v1017_v9 }
 0x4e2   : > { %1323 = vmatprep.subr.bf16.mxu1 %v1384_v0 }
 0x4e3   : > { %v1298_v13 = vpop.f32.mrf.mxu0 }
 0x4e5   : > { %v1535_v15 = vpop.f32.mrf.mxu0 }
 0x4e7   : > { %v1309_v16 = vpop.f32.mrf.mxu0 }
 0x4e8   : > { %1314 = vmatmul.mubr.msk.bf16.vlgmr.msra.gmra.mxu1 %vm408_vm1, %v743_v14  ;;  %v1024_v14 = vsel %vm480_vm4, %v1019_v11, 0 }
 0x4e9   : > { %v734_v17 = vpop.f32.mrf.mxu0  ;;  %1325 = vmatprep.mubr.msk.bf16.mxu1 %vm1385_vm0, %v1384_v0  ;;  %1324 = vmatpush3.bf16.msra.mxu1 %v859_v49 }
 0x4ea   : > { %1335 = vmatprep.subr.bf16.mxu1 %v1384_v0 }
 0x4eb   : > { %v1310_v18 = vpop.f32.mrf.mxu0 }
 0x5a0   : > { %v1540_v19 = vpop.f32.mrf.mxu1 }
 0x5a1   : > { %v732_v12 = vadd.f32 %v1535_v15, %v1540_v19 }
 0x5a2   : > { %v1303_v20 = vpop.f32.mrf.mxu1 }
 0x5a4   : > { %v688_v21 = vpop.f32.mrf.mxu1 }
 0x5a6   : > { %v1304_v22 = vpop.f32.mrf.mxu1 }
 0x5a8   : > { %v785_v23 = vpop.f32.mrf.mxu1 }
 0x5a9   : > { %v791_v24 = vmul.f32 0.35355338, %v785_v23 }
 0x5aa   : > { %v1315_v25 = vpop.f32.mrf.mxu1 }
 0x5ab   : > { %v792_v26 = vsel %vm462_vm3, -1e+09, %v791_v24  ;;  %v1243_v25 = vld [vmem:[%s1610_s6] ss:$0 sm:$0xff] }
 0x5ac   : > { %v788_v27 = vpop.f32.mrf.mxu1  ;;  %v793_v28 = vsel %vm408_vm1, %v792_v26, -inf }
 0x5ad   : > { %794 = vmax.xlane.f32.xlu0 %v793_v28  ;;  %v401_v28 = vld [vmem:[%s396_s16] sm:$0xff] }
 0x5ae   : > { %v1316_v29 = vpop.f32.mrf.mxu1 }
 0x636   : > { %v795_v30 = vpop.xlane.xlu0 %794 }
 0x637   : > { %v796_v31 = vsub.f32 %v792_v26, %v795_v30 }
 0x639   : > { %v797_v32 = vmul.f32 1.442695, %v796_v31 }
 0x63b   : > { %1366 = vpow2.f32 %v797_v32 }
 0x648   : > { %v1367_v33 = vpop.eup %1366 }
 0x649   : > { %v799_v34 = vsel %vm408_vm1, %v1367_v33, 0.0 }
 0x64a   : > { %800 = vadd.xlane.f32.xlu1 %v799_v34 }
 0x6d3   : > { %v801_v38 = vpop.xlane.xlu1 %800 }
 0x6d4   : > { %1368 = vrcp.f32 %v801_v38 }
 0x6e1   : > { %v1369_v41 = vpop.eup %1368 }
 0x6e2   : > { %v803_v42 = vmul.f32 %v1369_v41, %v1367_v33 }
 0x6e4   : > { %v804_v43 = vpack.c.bf16 %v803_v42, %v803_v42 }
 0x6e6   : > { %1320 = vmatmul.mubr.msk.bf16.vlgmr.msra.gmra.mxu0 %vm408_vm1, %v804_v43  ;;  %v1244_v43 = vld [vmem:[%s1611_s7] ss:$0 sm:$0xff] }
 0x6e7   : > { %1330 = vmatpush3.bf16.xpose.msra.mxu0 %v914_v44  ;;  %1331 = vmatprep.mubr.msk.bf16.mxu0 %vm1385_vm0, %v1384_v0 }
 0x6e8   : > { %1341 = vmatprep.subr.bf16.mxu0 %v1384_v0 }
 0x6ee   : > { %1332 = vmatmul.mubr.msk.bf16.vlgmr.msra.gmra.mxu0 %vm408_vm1, %v908_v46 }
 0x6ef   : > { %1343 = vmatprep.mubr.msk.bf16.mxu0 %vm1385_vm0, %v1384_v0  ;;  %1342 = vmatpush3.bf16.msra.mxu0 %v1024_v14 }
 0x7a6   : > { %v846_v50 = vpop.f32.mrf.mxu0 }
 0x7a7   : > { %v853_v51 = vpack.c.bf16 %v846_v50, %v846_v50 }
 0x7a8   : > { %v1321_v52 = vpop.f32.mrf.mxu0 }
 0x7a9   : > { %1326 = vmatmul.mubr.msk.bf16.vlgmr.msra.gmra.mxu1 %vm408_vm1, %v853_v51 }
 0x7aa   : > { %v849_v53 = vpop.f32.mrf.mxu0  ;;  %1337 = vmatprep.mubr.msk.bf16.mxu1 %vm1385_vm0, %v1384_v0  ;;  %1336 = vmatpush3.bf16.msra.mxu1 %v975_v5 }
 0x7ac   : > { %v1322_v54 = vpop.f32.mrf.mxu0 }
 0x7ae   : > { %v950_v55 = vpop.f32.mrf.mxu0 }
 0x7af   : > { %v956_v56 = vmul.f32 0.35355338, %v950_v55 }
 0x7b0   : > { %v1333_v57 = vpop.f32.mrf.mxu0 }
 0x7b1   : > { %v957_v58 = vsel %vm462_vm3, -1e+09, %v956_v56 }
 0x7b2   : > { %v953_v59 = vpop.f32.mrf.mxu0  ;;  %v958_v60 = vsel %vm408_vm1, %v957_v58, -inf }
 0x7b3   : > { %959 = vmax.xlane.f32.xlu0 %v958_v60 }
 0x7b4   : > { %v1334_v61 = vpop.f32.mrf.mxu0 }
 0x83c   : > { %v960_v62 = vpop.xlane.xlu0 %959 }
 0x83d   : > { %v961_v63 = vsub.f32 %v957_v58, %v960_v62 }
 0x83f   : > { %v962_v1 = vmul.f32 1.442695, %v961_v63 }
 0x841   : > { %1370 = vpow2.f32 %v962_v1 }
 0x84e   : > { %v1371_v2 = vpop.eup %1370 }
 0x84f   : > { %v964_v0 = vsel %vm408_vm1, %v1371_v2, 0.0 }
 0x850   : > { %965 = vadd.xlane.f32.xlu1 %v964_v0 }
 0x869   : > { %v895_v6 = vpop.f32.mrf.mxu1 }
 0x86a   : > { %v901_v7 = vadd.f32 %v895_v6, %v732_v12 }
 0x86b   : > { %v1327_v8 = vpop.f32.mrf.mxu1 }
 0x86d   : > { %v898_v10 = vpop.f32.mrf.mxu1 }
 0x86f   : > { %v1328_v13 = vpop.f32.mrf.mxu1 }
 0x8d9   : > { %v966_v16 = vpop.xlane.xlu1 %965 }
 0x8da   : > { %1372 = vrcp.f32 %v966_v16 }
 0x8e7   : > { %v1373_v17 = vpop.eup %1372 }
 0x8e8   : > { %v968_v18 = vmul.f32 %v1373_v17, %v1371_v2 }
 0x8ea   : > { %v969_v20 = vpack.c.bf16 %v968_v18, %v968_v18 }
 0x8ec   : > { %1338 = vmatmul.mubr.msk.bf16.vlgmr.msra.gmra.mxu1 %vm408_vm1, %v969_v20 }
 0x9ac   : > { %v1011_v15 = vpop.f32.mrf.mxu1 }
 0x9ad   : > { %v1018_v19 = vpack.c.bf16 %v1011_v15, %v1011_v15 }
 0x9ae   : > { %v1339_v21 = vpop.f32.mrf.mxu1 }
 0x9af   : > { %1344 = vmatmul.mubr.msk.bf16.vlgmr.msra.gmra.mxu0 %vm408_vm1, %v1018_v19 }
 0x9b0   : > { %v1014_v22 = vpop.f32.mrf.mxu1 }
 0x9b2   : > { %v1340_v23 = vpop.f32.mrf.mxu1 }
 0xa6f   : > { %v1060_v24 = vpop.f32.mrf.mxu0 }
 0xa70   : > { %v1066_v26 = vadd.f32 %v1060_v24, %v901_v7 }
 0xa71   : > { %v1345_v27 = vpop.f32.mrf.mxu0 }
 0xa72   : > { %v1074_v29 = vadd.f32 %v1243_v25, %v1066_v26 }
 0xa73   : > { %v1063_v30 = vpop.f32.mrf.mxu0 }
 0xa74   : > { %v1075_v31 = vadd.f32 %v1074_v29, %v401_v28 }
 0xa75   : > { %v1346_v32 = vpop.f32.mrf.mxu0 }
 0xa76   : > { %v1079_v33 = vsel %vm1078_vm5, %v1075_v31, 0.0 }
 0xa77   : > { %1080 = vadd.xlane.f32.xlu0 %v1079_v33 }
 0xb00   : > { %v1081_v34 = vpop.xlane.xlu0 %1080 }
 0xb01   : > { %v1083_v35 = vmul.f32 0.03125, %v1081_v34 }
 0xb03   : > { %v1084_v36 = vsub.f32 %v1075_v31, %v1083_v35 }
 0xb05   : > { %v1085_v37 = vmul.f32 %v1084_v36, %v1084_v36 }
 0xb07   : > { %v1086_v38 = vsel %vm1078_vm5, %v1085_v37, 0.0 }
 0xb08   : > { %1087 = vadd.xlane.f32.xlu1 %v1086_v38 }
 0xb91   : > { %v1088_v39 = vpop.xlane.xlu1 %1087 }
 0xb92   : > { %v1089_v40 = vmul.f32 0.03125, %v1088_v39 }
 0xb94   : > { %v1090_v41 = vadd.f32 1e-05, %v1089_v40 }
 0xb96   : > { %1374 = vrsqrt.f32 %v1090_v41 }
 0xba3   : > { %v1375_v42 = vpop.eup %1374 }
 0xba4   : > { %v1092_v44 = vmul.f32 %v1375_v42, %v1084_v36 }
 0xba6   : > { %v1099_v46 = vmul.f32 %v1244_v43, %v1092_v44 }
 0xba8   : > { %v1106_v47 = vadd.f32 %v1245_v45, %v1099_v46 }
 0xbaa   : > { %v1107_v48 = vsel %vm1078_vm5, %v1106_v47, 0.0 }
 0xbab   : > { %v1108_v49 = vrot.slane %v1107_v48, 4 }
 0xbad   : > { %v1109_v50 = vadd.f32 %v1108_v49, %v1107_v48 }
 0xbaf   : > { %v1110_v51 = vrot.slane %v1109_v50, 2 }
 0xbb1   : > { %v1111_v52 = vadd.f32 %v1110_v51, %v1109_v50 }
 0xbb3   : > { %v1112_v53 = vrot.slane %v1111_v52, 1 }
 0xbb5   : > { %v1113_v54 = vadd.f32 %v1112_v53, %v1111_v52 }
 0xbb7   : > { %v1115_v55 = vmul.f32 0.125, %v1113_v54 }
 0xbb9   : > { %1117 = vst.msk [vmem:[%s399_s25] sm:$0x1] %vm1116_vm6, %v1115_v55 }
 0xbba PF: > { %s19_s30 = sadd.s32 1, %s1382_s30  }
 0xbbb   : > { %p16_p4 = scmp.ge.s32.totalorder %s19_s30, 4  }
 0xbbd   :  { %18 = sbr.rel (!%p16_p4) target bundleno = 1 (0x1), region = 107 }

// kernel: siamprom_forward.9
= control target key start
LH: loop header
LB: loop body
LE: loop exit
PB: predicated region body
PF: predicated region fallthrough
CT: control target
= control target key end

     0   :  { %v383_v3 = vmov 0.0   ;;  %vm384_vm0 = vmmov 0   ;;  %s528_s0 = inlined_call_operand.vmem [shape: f32[2,32], index: 0, kind: input, shape index: {}]   ;;  %s529_s1 = inlined_call_operand.vmem [shape: f32[2,32], index: 1, kind: input, shape index: {}]   ;;  %s530_s2 = inlined_call_operand.vmem [shape: f32[2,32], index: 2, kind: input, shape index: {}]   ;;  %s531_s3 = inlined_call_operand.vmem [shape: f32[96,32], index: 3, kind: input, shape index: {}]   ;;  %s532_s4 = inlined_call_operand.vmem [shape: f32[1,32], index: 4, kind: input, shape index: {}]   ;;  %s533_s5 = inlined_call_operand.vmem [shape: f32[1,32], index: 5, kind: input, shape index: {}]   ;;  %s534_s6 = inlined_call_operand.vmem [shape: f32[1,32], index: 6, kind: input, shape index: {}]   ;;  %s535_s7 = inlined_call_operand.vmem [shape: f32[32,16], index: 7, kind: input, shape index: {}]   ;;  %s536_s8 = inlined_call_operand.vmem [shape: f32[1,16], index: 8, kind: input, shape index: {}]   ;;  %s537_s9 = inlined_call_operand.hbm [shape: f32[2,16], index: 9, kind: output, shape index: {}]  }
   0x1   :  { %v45_v0 = vld [vmem:[%s531_s3 + $0x30] sm:$0xff]  ;;  %v46_v1 = vld [vmem:[%s531_s3 + $0x38] sm:$0xff]  ;;  %324 = vmatprep.subr.bf16.mxu0 %v383_v3  ;;  %332 = vmatprep.subr.bf16.mxu1 %v383_v3  ;;  %v43_v6 = vld [vmem:[%s531_s3 + $0x20] sm:$0xff] }
   0x2   :  { %v37_v2 = vld [vmem:[%s531_s3 + $0x10] sm:$0xff]  ;;  %v49_v4 = vpack.c.bf16 %v46_v1, %v45_v0  ;;  %v38_v5 = vld [vmem:[%s531_s3 + $0x18] sm:$0xff]  ;;  %v44_v7 = vld [vmem:[%s531_s3 + $0x28] sm:$0xff]  ;;  %328 = vmatprep.mubr.msk.bf16.mxu0 %vm384_vm0, %v383_v3  ;;  %336 = vmatprep.mubr.msk.bf16.mxu1 %vm384_vm0, %v383_v3 }
   0x3   :  { %v41_v8 = vpack.c.bf16 %v38_v5, %v37_v2  ;;  %v35_v9 = vld [vmem:[%s531_s3] sm:$0xff]  ;;  %v36_v10 = vld [vmem:[%s531_s3 + $0x8] sm:$0xff]  ;;  %v48_v11 = vpack.c.bf16 %v44_v7, %v43_v6  ;;  %v140_v15 = vld [vmem:[%s531_s3 + $0x50] sm:$0xff] }
   0x4   :  { %325 = vmatpush3.bf16.msra.mxu0 %v49_v4  ;;  %v42_v12 = vld [vmem:[%s529_s1] sm:$0x3]  ;;  %v40_v13 = vpack.c.bf16 %v36_v10, %v35_v9  ;;  %v141_v16 = vld [vmem:[%s531_s3 + $0x58] sm:$0xff] }
   0x5   :  { %333 = vmatpush3.bf16.msra.mxu1 %v41_v8  ;;  %326 = vmatprep.subr.bf16.mxu0 %v383_v3  ;;  %v34_v14 = vld [vmem:[%s528_s0] sm:$0x3] }
   0x6   :  { %334 = vmatprep.subr.bf16.mxu1 %v383_v3 }
   0x7   :  { %14 = vsyncpa [#allocation3], 0  ;;  %v47_v17 = vpack.c.bf16 %v42_v12, %v42_v12  ;;  %vm50_vm1 = vcmask 261120   ;;  %v39_v18 = vpack.c.bf16 %v34_v14, %v34_v14  ;;  %v144_v19 = vpack.c.bf16 %v141_v16, %v140_v15  ;;  %v138_v20 = vld [vmem:[%s531_s3 + $0x40] sm:$0xff]  ;;  %v139_v21 = vld [vmem:[%s531_s3 + $0x48] sm:$0xff]  ;;  %s385_s28 = smov [#allocation2]  }
   0x8   :  { %327 = vmatpush3.bf16.msra.mxu0 %v48_v11  ;;  %v143_v22 = vpack.c.bf16 %v139_v21, %v138_v20  ;;  %v137_v23 = vld [vmem:[%s530_s2] sm:$0x3]  ;;  %vm199_vm2 = vcmask 254976   ;;  %v233_v47 = vld [vmem:[%s535_s7 + $0x10] sm:$0xff]  ;;  %v234_v48 = vld [vmem:[%s535_s7 + $0x18] sm:$0xff]  ;;  %s296_s29 = sshll.u32 %s385_s28, 4  ;;  %s297_s29 = int_to_ptr.vmem [resolvable:$true] %s296_s29 }
   0x9   :  { %335 = vmatpush3.bf16.msra.mxu1 %v40_v13  ;;  %340 = vmatprep.subr.bf16.mxu0 %v383_v3  ;;  %v142_v24 = vpack.c.bf16 %v137_v23, %v137_v23  ;;  %v307_v35 = vld [vmem:[%s532_s4] ss:$0 sm:$0xff]  ;;  %v237_v50 = vpack.c.bf16 %v234_v48, %v233_v47  ;;  %v232_v51 = vld [vmem:[%s535_s7 + $0x8] sm:$0xff]  ;;  %vm288_vm4 = vcmask 123904   ;;  %p366_p1 = scmp.lt.s32.totalorder %s297_s29, %s297_s29 }
   0xa   :  { %348 = vmatprep.subr.bf16.mxu1 %v383_v3  ;;  %v231_v49 = vld [vmem:[%s535_s7] sm:$0xff] }
   0xb   :  { %329 = vmatmul.mubr.msk.bf16.vlgmr.msra.gmra.mxu0 %vm50_vm1, %v47_v17  ;;  %v236_v52 = vpack.c.bf16 %v232_v51, %v231_v49  ;;  %v308_v57 = vld [vmem:[%s533_s5] ss:$0 sm:$0xff]  ;;  %s361_s5 = scalar_lea.vmem %s297_s29, 32 }
   0xc   :  { %337 = vmatmul.mubr.msk.bf16.vlgmr.msra.gmra.mxu1 %vm50_vm1, %v39_v18  ;;  %341 = vmatpush3.bf16.msra.mxu0 %v144_v19  ;;  %v309_v59 = vld [vmem:[%s534_s6] ss:$0 sm:$0xff]  ;;  %p362_p0 = scmp.ne.s32.totalorder %s297_s29, %s361_s5  ;;  %p367_p2 = scmp.lt.s32.totalorder %s361_s5, %s361_s5 }
   0xd   :  { %342 = vmatprep.subr.bf16.mxu0 %v383_v3  ;;  %344 = vmatprep.mubr.msk.bf16.mxu0 %vm384_vm0, %v383_v3  ;;  %v310_v1 = vld [vmem:[%s536_s8] ss:$0 sm:$0xff] }
   0xe   :  { %352 = vmatprep.mubr.msk.bf16.mxu1 %vm384_vm0, %v383_v3  ;;  %349 = vmatpush3.bf16.msra.mxu1 %v237_v50  ;;  %p368_p3 = por %p367_p2, %p366_p1 }
   0xf   :  { %350 = vmatprep.subr.bf16.mxu1 %v383_v3 }
  0x10   :  { %343 = vmatpush3.bf16.msra.mxu0 %v143_v22  ;;  %p369_p4 = pnand %p368_p3, %p362_p0 }
  0x12   :  { %351 = vmatpush3.bf16.msra.mxu1 %v236_v52 }
  0x13   :  { %345 = vmatmul.mubr.msk.bf16.vlgmr.msra.gmra.mxu0 %vm50_vm1, %v142_v24 }
  0xcb   :  { %v88_v25 = vpop.f32.mrf.mxu0 }
  0xcc   :  { %v131_v26 = vpop.f32.mrf.mxu1 }
  0xcd   :  { %v330_v27 = vpop.f32.mrf.mxu0  ;;  %v132_v32 = vadd.f32 %v131_v26, %v88_v25 }
  0xce   :  { %v338_v28 = vpop.f32.mrf.mxu1 }
  0xcf   :  { %v91_v29 = vpop.f32.mrf.mxu0 }
  0xd0   :  { %v134_v30 = vpop.f32.mrf.mxu1 }
  0xd1   :  { %v331_v31 = vpop.f32.mrf.mxu0 }
  0xd2   :  { %v339_v33 = vpop.f32.mrf.mxu1 }
  0xd3   :  { %v182_v34 = vpop.f32.mrf.mxu0 }
  0xd4   :  { %v188_v36 = vadd.f32 %v182_v34, %v132_v32 }
  0xd5   :  { %v346_v37 = vpop.f32.mrf.mxu0 }
  0xd6   :  { %v196_v38 = vadd.f32 %v307_v35, %v188_v36 }
  0xd7   :  { %v185_v39 = vpop.f32.mrf.mxu0 }
  0xd8   :  { %v200_v40 = vsel %vm199_vm2, %v196_v38, 0.0 }
  0xd9   :  { %v347_v41 = vpop.f32.mrf.mxu0  ;;  %201 = vadd.xlane.f32.xlu0 %v200_v40 }
 0x162   :  { %v202_v42 = vpop.xlane.xlu0 %201 }
 0x163   :  { %v204_v43 = vmul.f32 0.03125, %v202_v42 }
 0x165   :  { %v205_v44 = vsub.f32 %v196_v38, %v204_v43 }
 0x167   :  { %v206_v45 = vmul.f32 %v205_v44, %v205_v44 }
 0x169   :  { %v207_v46 = vsel %vm199_vm2, %v206_v45, 0.0 }
 0x16a   :  { %208 = vadd.xlane.f32.xlu0 %v207_v46 }
 0x1f3   :  { %v209_v53 = vpop.xlane.xlu0 %208 }
 0x1f4   :  { %v210_v54 = vmul.f32 0.03125, %v209_v53 }
 0x1f6   :  { %v211_v55 = vadd.f32 1e-05, %v210_v54 }
 0x1f8   :  { %359 = vrsqrt.f32 %v211_v55 }
 0x205   :  { %v360_v56 = vpop.eup %359 }
 0x206   :  { %v213_v58 = vmul.f32 %v360_v56, %v205_v44 }
 0x208   :  { %v220_v60 = vmul.f32 %v308_v57, %v213_v58 }
 0x20a   :  { %v227_v61 = vadd.f32 %v309_v59, %v220_v60 }
 0x20c   :  { %vm228_vm3 = vcmp.ge.f32.partialorder %v227_v61, 0.0  ;;  %v229_v62 = vmul.f32 0.01, %v227_v61 }
 0x20e   :  { %v230_v63 = vsel %vm228_vm3, %v227_v61, %v229_v62 }
 0x20f   :  { %v235_v0 = vpack.c.bf16 %v230_v63, %v230_v63 }
 0x211   :  { %353 = vmatmul.mubr.msk.bf16.vlgmr.msra.gmra.mxu1 %vm50_vm1, %v235_v0 }
 0x2d1   :  { %v282_v2 = vpop.f32.mrf.mxu1 }
 0x2d2   :  { %v283_v3 = vadd.f32 %v310_v1, %v282_v2 }
 0x2d3   :  { %v354_v4 = vpop.f32.mrf.mxu1 }
 0x2d4   :  { %289 = vst.msk [vmem:[#allocation2] sm:$0x3] %vm288_vm4, %v283_v3 }
 0x2d5   :  { %v285_v5 = vpop.f32.mrf.mxu1 }
 0x2d6   :  { %372 = shalt.err (!%p369_p4)
}
 0x2d7   :  { %299 = dma.vmem_to_hbm [thread:$0]  %s297_s29, 32, %s537_s9, [#allocation3]   ;;  %v355_v6 = vpop.f32.mrf.mxu1 }
 0x2d8   :  { %381 = dma.done.wait [#allocation3], 32  }
 0x2d9   :  { %382 = vsyncadd [#allocation3], 4294967264 }
 0x2da   :  { %303 = vsyncpa [#allocation3], 1 }

// kernel: siamprom_forward.8
= control target key start
LH: loop header
LB: loop body
LE: loop exit
PB: predicated region body
PF: predicated region fallthrough
CT: control target
= control target key end

     0   :  { %v833_v0 = vmov 0.0   ;;  %vm834_vm0 = vmmov 0   ;;  %vm61_vm1 = vcmask 261120   ;;  %vm106_vm2 = vcmask 523264   ;;  %s1064_s2 = inlined_call_operand.vmem [shape: f32[16,64], index: 2, kind: input, shape index: {}]   ;;  %s1065_s5 = inlined_call_operand.vmem [shape: f32[16,64], index: 5, kind: input, shape index: {}]   ;;  %s1066_s7 = inlined_call_operand.vmem [shape: f32[16,32], index: 7, kind: input, shape index: {}, may-alias: {0,7}]   ;;  %s1067_s8 = inlined_call_operand.vmem [shape: f32[2,16], index: 8, kind: input, shape index: {}]   ;;  %s1068_s9 = inlined_call_operand.vmem [shape: f32[32,32], index: 9, kind: input, shape index: {}]   ;;  %s1069_s10 = inlined_call_operand.vmem [shape: f32[1,32], index: 10, kind: input, shape index: {}]   ;;  %s1070_s11 = inlined_call_operand.vmem [shape: f32[1,32], index: 11, kind: input, shape index: {}]   ;;  %s1071_s12 = inlined_call_operand.vmem [shape: f32[1,32], index: 12, kind: input, shape index: {}]   ;;  %s1072_s13 = inlined_call_operand.vmem [shape: f32[2,32], index: 13, kind: output, shape index: {}]   ;;  %s1073_s1 = inlined_call_operand.vmem [shape: f32[32,64], index: 1, kind: input, shape index: {}]   ;;  %s1074_s4 = inlined_call_operand.vmem [shape: f32[32,64], index: 4, kind: input, shape index: {}]   ;;  %s1075_s0 = inlined_call_operand.vmem [shape: f32[16,32], index: 0, kind: input, shape index: {}, may-alias: {0,7}]   ;;  %s1076_s3 = inlined_call_operand.vmem [shape: f32[1,64], index: 3, kind: input, shape index: {}]   ;;  %s1077_s6 = inlined_call_operand.vmem [shape: f32[1,64], index: 6, kind: input, shape index: {}]  }
   0x1   :  { %656 = vmatprep.subr.bf16.mxu0 %v833_v0  ;;  %664 = vmatprep.subr.bf16.mxu1 %v833_v0  ;;  %v49_v1 = vld [vmem:[%s1073_s1 + $0x10] sm:$0xff]  ;;  %v50_v2 = vld [vmem:[%s1073_s1 + $0x18] sm:$0xff]  ;;  %v47_v6 = vld [vmem:[%s1073_s1] sm:$0xff]  ;;  %v963_v30 = vmov 0.0   ;;  %v813_v31 = vmov 0.0  }
   0x2   :  { %v111_v3 = vld [vmem:[%s1074_s4 + $0x10] sm:$0xff]  ;;  %v53_v4 = vpack.c.bf16 %v50_v2, %v49_v1  ;;  %v112_v5 = vld [vmem:[%s1074_s4 + $0x18] sm:$0xff]  ;;  %v48_v7 = vld [vmem:[%s1073_s1 + $0x8] sm:$0xff]  ;;  %660 = vmatprep.mubr.msk.bf16.mxu0 %vm834_vm0, %v833_v0  ;;  %668 = vmatprep.mubr.msk.bf16.mxu1 %vm834_vm0, %v833_v0 }
   0x3   :  { %v114_v8 = vpack.c.bf16 %v112_v5, %v111_v3  ;;  %v109_v9 = vld [vmem:[%s1074_s4] sm:$0xff]  ;;  %v110_v10 = vld [vmem:[%s1074_s4 + $0x8] sm:$0xff]  ;;  %v52_v11 = vpack.c.bf16 %v48_v7, %v47_v6 }
   0x4   :  { %657 = vmatpush3.bf16.msra.mxu0 %v53_v4  ;;  %v45_v12 = vld [vmem:[%s1075_s0] sm:$0xff]  ;;  %v46_v13 = vld [vmem:[%s1075_s0 + $0x8] sm:$0xff]  ;;  %v113_v14 = vpack.c.bf16 %v110_v10, %v109_v9 }
   0x5   :  { %665 = vmatpush3.bf16.msra.mxu1 %v114_v8  ;;  %658 = vmatprep.subr.bf16.mxu0 %v833_v0  ;;  %v51_v15 = vpack.c.bf16 %v46_v13, %v45_v12  ;;  %v623_v16 = vld [vmem:[%s1076_s3] ss:$0 sm:$0xff]  ;;  %s965_s3 = smov 0  }
   0x6   :  { %666 = vmatprep.subr.bf16.mxu1 %v833_v0  ;;  %v625_v17 = vld [vmem:[%s1077_s6] ss:$0 sm:$0xff] }
   0x8   :  { %659 = vmatpush3.bf16.msra.mxu0 %v52_v11 }
   0x9   :  { %667 = vmatpush3.bf16.msra.mxu1 %v113_v14 }
   0xb   :  { %661 = vmatmul.mubr.msk.bf16.vlgmr.msra.gmra.mxu0 %vm61_vm1, %v51_v15 }
   0xc   :  { %669 = vmatmul.mubr.msk.bf16.vlgmr.msra.gmra.mxu1 %vm61_vm1, %v51_v15 }
  0xcb   :  { %v99_v18 = vpop.f32.mrf.mxu0 }
  0xcc   :  { %v100_v19 = vadd.f32 %v623_v16, %v99_v18  ;;  %v156_v20 = vpop.f32.mrf.mxu1 }
  0xcd   :  { %v157_v21 = vadd.f32 %v625_v17, %v156_v20  ;;  %v662_v22 = vpop.f32.mrf.mxu0 }
  0xce   :  { %107 = vst.msk [vmem:[#allocation2] sm:$0xff] %vm106_vm2, %v100_v19  ;;  %v670_v23 = vpop.f32.mrf.mxu1 }
  0xcf   :  { %163 = vst.msk [vmem:[#allocation3] sm:$0xff] %vm106_vm2, %v157_v21  ;;  %v102_v24 = vpop.f32.mrf.mxu0 }
  0xd0   :  { %v103_v25 = vadd.f32 %v623_v16, %v102_v24  ;;  %v159_v26 = vpop.f32.mrf.mxu1 }
  0xd1   :  { %v160_v27 = vadd.f32 %v625_v17, %v159_v26  ;;  %v663_v28 = vpop.f32.mrf.mxu0 }
  0xd2   :  { %108 = vst.msk [vmem:[#allocation2 + $0x8] sm:$0xff] %vm106_vm2, %v103_v25  ;;  %v671_v29 = vpop.f32.mrf.mxu1 }
  0xd3   :  { %164 = vst.msk [vmem:[#allocation3 + $0x8] sm:$0xff] %vm106_vm2, %v160_v27 }
  0xd4 LB: > { %v176_v32 = vld [vmem:[%s1064_s2] sm:$0xff]  ;;  %v177_v33 = vld [vmem:[%s1064_s2 + $0x8] sm:$0xff]  ;;  %v835_v34 = vmov 0.0   ;;  %vm836_vm3 = vmmov 0   ;;  %v178_v36 = vpack.c.bf16 %v815_v31, %v815_v31  ;;  %s837_s15 = smov 80   ;;  %vm183_vm4 = vcmask 130048   ;;  %s819_s3 = sphi %s965_s3, %s170_s3   ;;  %v815_v31 = vphi %v813_v31, %v251_v31   ;;  %v811_v30 = vphi %v963_v30, %v245_v30  }
  0xd5   : > { %672 = vmatprep.subr.bf16.mxu0 %v835_v34  ;;  %v179_v35 = vpack.c.bf16 %v177_v33, %v176_v32  ;;  %674 = vmatprep.mubr.msk.bf16.mxu0 %vm836_vm3, %v835_v34  ;;  %s627_s16 = sshll.u32 %s819_s3, 1  ;;  %s838_s18 = smov 96   ;;  %vm257_vm5 = vcmask 123904  }
  0xd6   : > { %181 = vrot.lane.b32.xlu0 %v178_v36, %s837_s15  ;;  %s174_s17 = scalar_lea.vmem [#allocation2], %s627_s16  ;;  %s839_s19 = smov 16  }
  0xd7   : > { %673 = vmatpush3.bf16.msra.mxu0 %v179_v35  ;;  %s840_s20 = smov 32   ;;  %s256_s21 = scalar_lea.vmem [#allocation4], %s627_s16 }
  0xd8   : > { %s170_s3 = sadd.s32 1, %s819_s3  }
  0xd9   : > { %v175_v38 = vld [vmem:[%s174_s17] sm:$0x3]  ;;  %p167_p0 = scmp.ge.s32.totalorder %s170_s3, 8  }
  0xda   :  { %v821_v56 = vmov (%p167_p0), 0.0   ;;  %v825_v57 = vmov (%p167_p0), 0.0   ;;  %s991_s22 = smov (%p167_p0), 0  }
 0x148   : > { %v182_v37 = vpop.permute.xlu0 %181 }
 0x149   : > { %675 = vmatmul.mubr.msk.bf16.vlgmr.msra.gmra.mxu0 %vm183_vm4, %v182_v37 }
 0x209   : > { %v221_v39 = vpop.f32.mrf.mxu0 }
 0x20a   : > { %v227_v40 = vadd.f32 %v221_v39, %v175_v38 }
 0x20b   : > { %v676_v41 = vpop.f32.mrf.mxu0 }
 0x20c   : > { %765 = vtanh.f32 %v227_v40  ;;  %v629_v45 = vmul.f32 -1.442695, %v227_v40 }
 0x20d   : > { %v224_v42 = vpop.f32.mrf.mxu0 }
 0x20e   : > { %767 = vpow2.f32 %v629_v45 }
 0x20f   : > { %v677_v43 = vpop.f32.mrf.mxu0 }
 0x219   : > { %v766_v44 = vpop.eup %765 }
 0x21a   : > { %237 = vrot.lane.b32.xlu0 %v766_v44, %s838_s18 }
 0x21b   : > { %v768_v46 = vpop.eup %767 }
 0x21c   : > { %v231_v47 = vadd.f32 1.0, %v768_v46 }
 0x21e   : > { %769 = vrcp.f32 %v231_v47 }
 0x22b   : > { %v770_v48 = vpop.eup %769 }
 0x22c   : > { %v235_v51 = vmul.f32 %v811_v30, %v770_v48 }
 0x28c   : > { %v238_v49 = vpop.permute.xlu0 %237 }
 0x28d   : > { %v240_v50 = vmul.f32 %v770_v48, %v238_v49 }
 0x28f   : > { %242 = vrot.lane.b32.xlu1 %v240_v50, %s839_s19 }
 0x301   : > { %v243_v52 = vpop.permute.xlu1 %242 }
 0x302   : > { %v245_v30 = vadd.f32 %v243_v52, %v235_v51  }
 0x304   : > { %771 = vtanh.f32 %v245_v30 }
 0x311   : > { %v772_v53 = vpop.eup %771 }
 0x312   : > { %248 = vrot.lane.b32.xlu1 %v772_v53, %s840_s20 }
 0x384   : > { %v249_v54 = vpop.permute.xlu1 %248 }
 0x385   : > { %v251_v31 = vmul.f32 %v770_v48, %v249_v54  }
 0x387   : > { %253 = vrot.lane.b32.xlu0 %v251_v31, %s837_s15 }
 0x3f6   :  { %169 = sbr.rel (!%p167_p0) target bundleno = 212 (0xd4), region = 90 }
 0x3f9   : > { %v254_v55 = vpop.permute.xlu0 %253 }
 0x3fa   : > { %258 = vst.msk [vmem:[%s256_s21] sm:$0x3] %vm257_vm5, %v254_v55 }
 0x3fb LB: > { %v271_v58 = vld [vmem:[%s1065_s5] sm:$0xff]  ;;  %v272_v59 = vld [vmem:[%s1065_s5 + $0x8] sm:$0xff]  ;;  %v841_v60 = vmov 0.0   ;;  %vm842_vm6 = vmmov 0   ;;  %v273_v62 = vpack.c.bf16 %v827_v57, %v827_v57  ;;  %s843_s2 = smov 80   ;;  %s267_s26 = ssub.s32 7, %s831_s22  ;;  %s831_s22 = sphi %s991_s22, %s264_s22   ;;  %v827_v57 = vphi %v825_v57, %v346_v57   ;;  %v823_v56 = vphi %v821_v56, %v340_v56  }
 0x3fc   : > { %678 = vmatprep.subr.bf16.mxu0 %v841_v60  ;;  %v274_v61 = vpack.c.bf16 %v272_v59, %v271_v58  ;;  %680 = vmatprep.mubr.msk.bf16.mxu0 %vm842_vm6, %v841_v60  ;;  %s1005_s4 = sshll.u32 %s267_s26, 1  ;;  %s844_s28 = smov 96  }
 0x3fd   : > { %276 = vrot.lane.b32.xlu0 %v273_v62, %s843_s2  ;;  %s269_s27 = scalar_lea.vmem [#allocation3], %s1005_s4  ;;  %s845_s0 = smov 16  }
 0x3fe   : > { %679 = vmatpush3.bf16.msra.mxu0 %v274_v61  ;;  %v270_v1 = vld [vmem:[%s269_s27] sm:$0x3]  ;;  %s846_s3 = smov 32   ;;  %s351_s6 = scalar_lea.vmem [#allocation5], %s1005_s4 }
 0x3ff   : > { %s264_s22 = sadd.s32 1, %s831_s22  }
 0x400   : > { %p261_p1 = scmp.ge.s32.totalorder %s264_s22, 8  }
 0x401   :  { %684 = vmatprep.subr.bf16.mxu0 (%p261_p1), %v833_v0  ;;  %690 = vmatprep.subr.bf16.mxu1 (%p261_p1), %v833_v0  ;;  %v362_v19 = vld [vmem:[%s1068_s9 + $0x10] sm:$0xff] (%p261_p1)  ;;  %v363_v20 = vld [vmem:[%s1068_s9 + $0x18] sm:$0xff] (%p261_p1)  ;;  %v356_v21 = vld [vmem:[%s1068_s9] sm:$0xff] (%p261_p1)  ;;  %vm587_vm7 = vcmask (%p261_p1), 254976  }
 0x402   :  { %v365_v22 = vpack.c.bf16 (%p261_p1), %v363_v20, %v362_v19  ;;  %v357_v23 = vld [vmem:[%s1068_s9 + $0x8] sm:$0xff] (%p261_p1)  ;;  %692 = vmatprep.mubr.msk.bf16.mxu1 (%p261_p1), %vm834_vm0, %v833_v0  ;;  %v354_v28 = vld [vmem:[#allocation4] sm:$0xff] (%p261_p1) }
 0x403   :  { %v359_v26 = vpack.c.bf16 (%p261_p1), %v357_v23, %v356_v21  ;;  %v355_v29 = vld [vmem:[#allocation4 + $0x8] sm:$0xff] (%p261_p1)  ;;  %v635_v37 = vld [vmem:[%s1069_s10] ss:$0 sm:$0xff] (%p261_p1) }
 0x404   :  { %v358_v30 = vpack.c.bf16 (%p261_p1), %v355_v29, %v354_v28  ;;  %v465_v42 = vld [vmem:[%s1066_s7 + $0x8] sm:$0xff] (%p261_p1)  ;;  %v464_v45 = vld [vmem:[%s1066_s7] sm:$0xff] (%p261_p1) }
 0x405   :  { %691 = vmatpush3.bf16.msra.mxu1 (%p261_p1), %v359_v26 }
 0x408   :  { %693 = vmatmul.mubr.msk.bf16.vlgmr.msra.gmra.mxu1 (%p261_p1), %vm183_vm4, %v358_v30 }
 0x46f   : > { %v277_v63 = vpop.permute.xlu0 %276 }
 0x470   : > { %681 = vmatmul.mubr.msk.bf16.vlgmr.msra.gmra.mxu0 %vm183_vm4, %v277_v63 }
 0x471   :  { %686 = vmatprep.mubr.msk.bf16.mxu0 (%p261_p1), %vm834_vm0, %v833_v0  ;;  %685 = vmatpush3.bf16.msra.mxu0 (%p261_p1), %v365_v22 }
 0x472   :  { %696 = vmatprep.subr.mxu0 (%p261_p1), %v833_v0 }
 0x4c8   :  { %v448_v32 = vpop.f32.mrf.mxu1 (%p261_p1) }
 0x4ca   :  { %v694_v34 = vpop.f32.mrf.mxu1 (%p261_p1) }
 0x4cc   :  { %v451_v38 = vpop.f32.mrf.mxu1 (%p261_p1) }
 0x4ce   :  { %v695_v41 = vpop.f32.mrf.mxu1 (%p261_p1) }
 0x530   : > { %v316_v2 = vpop.f32.mrf.mxu0 }
 0x531   : > { %v322_v3 = vadd.f32 %v316_v2, %v270_v1 }
 0x532   : > { %v682_v4 = vpop.f32.mrf.mxu0 }
 0x533   : > { %773 = vtanh.f32 %v322_v3  ;;  %v632_v8 = vmul.f32 -1.442695, %v322_v3  ;;  %v636_v4 = vld [vmem:[%s1070_s11] ss:$0 sm:$0xff] (%p261_p1) }
 0x534   : > { %v319_v5 = vpop.f32.mrf.mxu0 }
 0x535   : > { %775 = vpow2.f32 %v632_v8 }
 0x536   : > { %v683_v6 = vpop.f32.mrf.mxu0 }
 0x537   :  { %v637_v6 = vld [vmem:[%s1071_s12] ss:$0 sm:$0xff] (%p261_p1) }
 0x540   : > { %v774_v7 = vpop.eup %773 }
 0x541   : > { %332 = vrot.lane.b32.xlu0 %v774_v7, %s844_s28 }
 0x542   : > { %v776_v9 = vpop.eup %775 }
 0x543   : > { %v326_v10 = vadd.f32 1.0, %v776_v9 }
 0x545   : > { %777 = vrcp.f32 %v326_v10 }
 0x552   : > { %v778_v11 = vpop.eup %777 }
 0x553   : > { %v330_v14 = vmul.f32 %v823_v56, %v778_v11 }
 0x5b3   : > { %v333_v12 = vpop.permute.xlu0 %332 }
 0x5b4   : > { %v335_v13 = vmul.f32 %v778_v11, %v333_v12 }
 0x5b6   : > { %337 = vrot.lane.b32.xlu1 %v335_v13, %s845_s0  ;;  %v513_v13 = vld [vmem:[%s1067_s8] sm:$0x3] (%p261_p1) }
 0x628   : > { %v338_v15 = vpop.permute.xlu1 %337 }
 0x629   : > { %v340_v56 = vadd.f32 %v338_v15, %v330_v14  }
 0x62b   : > { %779 = vtanh.f32 %v340_v56 }
 0x638   : > { %v780_v16 = vpop.eup %779 }
 0x639   : > { %343 = vrot.lane.b32.xlu1 %v780_v16, %s846_s3 }
 0x6ab   : > { %v344_v17 = vpop.permute.xlu1 %343 }
 0x6ac   : > { %v346_v57 = vmul.f32 %v778_v11, %v344_v17  }
 0x6ae   : > { %348 = vrot.lane.b32.xlu0 %v346_v57, %s843_s2 }
 0x71d   :  { %263 = sbr.rel (!%p261_p1) target bundleno = 1019 (0x3fb), region = 101 }
 0x720   : > { %v349_v18 = vpop.permute.xlu0 %348 }
 0x721   : > { %353 = vst.msk [vmem:[%s351_s6] sm:$0x3] %vm257_vm5, %v349_v18 }
 0x728   :  { %v360_v24 = vld [vmem:[#allocation5] sm:$0xff]  ;;  %v361_v25 = vld [vmem:[#allocation5 + $0x8] sm:$0xff] }
 0x729   :  { %v364_v27 = vpack.c.bf16 %v361_v25, %v360_v24 }
 0x72b   :  { %687 = vmatmul.mubr.msk.bf16.vlgmr.msra.gmra.mxu0 %vm183_vm4, %v364_v27 }
 0x72c   :  { %700 = vmatprep.mubr.msk.f32.mxu0 %vm834_vm0, %v833_v0 }
 0x7eb   :  { %v404_v31 = vpop.f32.mrf.mxu0 }
 0x7ec   :  { %v449_v35 = vadd.f32 %v448_v32, %v404_v31 }
 0x7ed   :  { %v688_v33 = vpop.f32.mrf.mxu0 }
 0x7ee   :  { %v462_v43 = vadd.f32 %v635_v37, %v449_v35 }
 0x7ef   :  { %v407_v36 = vpop.f32.mrf.mxu0 }
 0x7f0   :  { %v452_v39 = vadd.f32 %v451_v38, %v407_v36  ;;  %v466_v48 = vadd.f32 %v464_v45, %v462_v43 }
 0x7f1   :  { %v689_v40 = vpop.f32.mrf.mxu0 }
 0x7f2   :  { %v463_v44 = vadd.f32 %v635_v37, %v452_v39  ;;  %v470_v49 = vsel %vm61_vm1, %v466_v48, 0.0 }
 0x7f4   :  { %v467_v46 = vadd.f32 %v465_v42, %v463_v44 }
 0x7f6   :  { %v473_v47 = vsel %vm61_vm1, %v467_v46, 0.0 }
 0x7f7   :  { %474 = vadd.xlane.f32.xlu0 %v473_v47 }
 0x7fb   :  { %471 = vadd.xlane.f32.xlu0 %v470_v49 }
 0x880   :  { %v475_v50 = vpop.xlane.xlu0 %474 }
 0x881   :  { %v478_v51 = vmul.f32 0.03125, %v475_v50 }
 0x883   :  { %v480_v52 = vsub.f32 %v467_v46, %v478_v51 }
 0x884   :  { %v472_v53 = vpop.xlane.xlu0 %471 }
 0x885   :  { %v477_v54 = vmul.f32 0.03125, %v472_v53  ;;  %v482_v55 = vmul.f32 %v480_v52, %v480_v52 }
 0x887   :  { %v479_v56 = vsub.f32 %v466_v48, %v477_v54  ;;  %v486_v57 = vsel %vm61_vm1, %v482_v55, 0.0 }
 0x888   :  { %487 = vadd.xlane.f32.xlu1 %v486_v57 }
 0x889   :  { %v481_v58 = vmul.f32 %v479_v56, %v479_v56 }
 0x88b   :  { %v483_v59 = vsel %vm61_vm1, %v481_v58, 0.0 }
 0x88c   :  { %484 = vadd.xlane.f32.xlu1 %v483_v59 }
 0x911   :  { %v488_v60 = vpop.xlane.xlu1 %487 }
 0x912   :  { %v490_v61 = vmul.f32 0.03125, %v488_v60 }
 0x914   :  { %v492_v62 = vadd.f32 1e-05, %v490_v61 }
 0x915   :  { %v485_v63 = vpop.xlane.xlu1 %484 }
 0x916   :  { %781 = vrsqrt.f32 %v492_v62  ;;  %v489_v1 = vmul.f32 0.03125, %v485_v63 }
 0x918   :  { %v491_v2 = vadd.f32 1e-05, %v489_v1 }
 0x91a   :  { %783 = vrsqrt.f32 %v491_v2 }
 0x923   :  { %v782_v3 = vpop.eup %781 }
 0x924   :  { %v496_v5 = vmul.f32 %v782_v3, %v480_v52 }
 0x926   :  { %v504_v7 = vmul.f32 %v636_v4, %v496_v5 }
 0x927   :  { %v784_v8 = vpop.eup %783 }
 0x928   :  { %v512_v9 = vadd.f32 %v637_v6, %v504_v7  ;;  %v495_v10 = vmul.f32 %v784_v8, %v479_v56 }
 0x92a   :  { %697 = vmatpush3.msra.mxu0 %v512_v9  ;;  %v503_v11 = vmul.f32 %v636_v4, %v495_v10 }
 0x92b   :  { %698 = vmatprep.subr.mxu0 %v833_v0 }
 0x92c   :  { %v511_v12 = vadd.f32 %v637_v6, %v503_v11 }
 0x92e   :  { %699 = vmatpush3.msra.mxu0 %v511_v12 }
 0x92f   :  { %701 = vmatmul.mubr.msk.f32.vlgmr.msra.gmra.mxu0 %vm183_vm4, %v513_v13 }
 0x9ef   :  { %v583_v14 = vpop.f32.mrf.mxu0 }
 0x9f0   :  { %588 = vst.msk [vmem:[%s1072_s13] sm:$0x3] %vm587_vm7, %v583_v14 }
 0x9f1   :  { %v702_v15 = vpop.f32.mrf.mxu0 }

</bundles_post_ra>
